<compile_context>
chip_gen: v7x
topology: tpu7x:2x2x1
jax: 0.10.0
libtpu: 0.0.40
codegen_flags: <defaults>
</compile_context>

<pallas_src>
import functools

import jax
import jax.numpy as jnp
from jax import lax
from jax.experimental import pallas as pl
from jax.experimental.pallas import tpu as pltpu

NUM_VERTS = 6890
OUT_DIM = NUM_VERTS * 3  # 20670
UNROLL = 8


# ----------------------------------------------------------------------------
# Kernel 1: the whole stacked LSTM over a chunk of timesteps (all layers
# fused).  h/c carries persist across chunks in VMEM scratch.
# ----------------------------------------------------------------------------
def _fused_lstm_kernel(*refs, hidden_dim, t_chunk, num_layers, unroll):
    H = hidden_dim
    L = num_layers

    x_ref = refs[0]
    wih_refs = [refs[1 + 3 * l] for l in range(L)]
    whh_refs = [refs[2 + 3 * l] for l in range(L)]
    b_refs = [refs[3 + 3 * l] for l in range(L)]
    out_ref = refs[1 + 3 * L]
    h_scr = refs[2 + 3 * L]        # (L, 1, H)
    c_scr = refs[3 + 3 * L]        # (L, 1, H)
    gx_scr = refs[4 + 3 * L]       # (t_chunk, 4H)

    @pl.when(pl.program_id(0) == 0)
    def _():
        h_scr[...] = jnp.zeros_like(h_scr)
        c_scr[...] = jnp.zeros_like(c_scr)

    # Layer-0 input projection for the whole chunk: one big MXU matmul.
    gx_scr[...] = (jnp.dot(x_ref[...], wih_refs[0][...],
                           preferred_element_type=jnp.float32)
                   + b_refs[0][...])

    # Hoist loop-invariant weights out of the recurrence.
    whh = [whh_refs[l][...] for l in range(L)]
    wih = [None] + [wih_refs[l][...] for l in range(1, L)]
    bias = [None] + [b_refs[l][...] for l in range(1, L)]

    def cell(gates, c_prev):
        # 2 full-width EUP pushes over the (1, 4H) row, slice gates afterwards
        # (PyTorch gate order: i, f, g, o).
        sg = jax.nn.sigmoid(gates)
        th = jnp.tanh(gates)
        i_g = sg[:, 0 * H:1 * H]
        f_g = sg[:, 1 * H:2 * H]
        g_g = th[:, 2 * H:3 * H]
        o_g = sg[:, 3 * H:4 * H]
        c_new = f_g * c_prev + i_g * g_g
        h_new = o_g * jnp.tanh(c_new)
        return h_new, c_new

    n_groups = t_chunk // unroll

    def group(g, carry):
        hs, cs = carry
        hs = list(hs)
        cs = list(cs)
        base = pl.multiple_of(g * unroll, unroll)
        gx_tile = gx_scr[pl.ds(base, unroll), :]      # aligned (8, 4H) load
        out_rows = []
        for j in range(unroll):                       # Python-unrolled steps
            # layer 0
            gates0 = gx_tile[j:j + 1, :] + jnp.dot(
                hs[0], whh[0], preferred_element_type=jnp.float32)
            hs[0], cs[0] = cell(gates0, cs[0])
            # layers 1..L-1 (independent of layer-0 step j+1 -> ILP in-block)
            for l in range(1, L):
                gates = (jnp.dot(hs[l - 1], wih[l],
                                 preferred_element_type=jnp.float32)
                         + jnp.dot(hs[l], whh[l],
                                   preferred_element_type=jnp.float32)
                         + bias[l])
                hs[l], cs[l] = cell(gates, cs[l])
            out_rows.append(hs[L - 1])
        # One aligned (8, H) slab store per group instead of 8 masked row vst.
        out_ref[pl.ds(base, unroll), :] = jnp.concatenate(out_rows, axis=0)
        return (tuple(hs), tuple(cs))

    hs0 = tuple(h_scr[l] for l in range(L))
    cs0 = tuple(c_scr[l] for l in range(L))
    hs, cs = lax.fori_loop(0, n_groups, group, (hs0, cs0))
    for l in range(L):                                # carry into next chunk
        h_scr[l] = hs[l]
        c_scr[l] = cs[l]


def fused_lstm_forward(x_seq, wih_list, whh_list, b_list, *, hidden_dim,
                       t_chunk, unroll):
    T_pad, in_dim = x_seq.shape
    H = hidden_dim
    L = len(wih_list)
    assert T_pad % t_chunk == 0 and t_chunk % unroll == 0

    kernel = functools.partial(_fused_lstm_kernel, hidden_dim=H,
                               t_chunk=t_chunk, num_layers=L, unroll=unroll)

    in_specs = [pl.BlockSpec((t_chunk, in_dim), lambda i: (i, 0))]
    args = [x_seq]
    for l in range(L):
        d_in = in_dim if l == 0 else H
        in_specs += [
            pl.BlockSpec((d_in, 4 * H), lambda i: (0, 0)),
            pl.BlockSpec((H, 4 * H), lambda i: (0, 0)),
            pl.BlockSpec((1, 4 * H), lambda i: (0, 0)),
        ]
        args += [wih_list[l], whh_list[l], b_list[l]]

    return pl.pallas_call(
        kernel,
        out_shape=jax.ShapeDtypeStruct((T_pad, H), jnp.float32),
        grid_spec=pltpu.PrefetchScalarGridSpec(
            num_scalar_prefetch=0,
            grid=(T_pad // t_chunk,),
            in_specs=in_specs,
            out_specs=pl.BlockSpec((t_chunk, H), lambda i: (i, 0)),
            scratch_shapes=[
                pltpu.VMEM((L, 1, H), jnp.float32),          # h carries
                pltpu.VMEM((L, 1, H), jnp.float32),          # c carries
                pltpu.VMEM((t_chunk, 4 * H), jnp.float32),   # chunk gate pre-acts
            ],
        ),
        compiler_params=pltpu.CompilerParams(
            dimension_semantics=("arbitrary",)),   # recurrence => sequential
    )(*args)


# ----------------------------------------------------------------------------
# Kernel 2: hidden2dbs linear (no bias), bf16 weights, f32 accumulation,
# tiled over T and N (lane-dense output tiles, even N-tile count).
# ----------------------------------------------------------------------------
def _linear_kernel(a_ref, w_ref, o_ref):
    o_ref[...] = jnp.dot(a_ref[...].astype(jnp.bfloat16), w_ref[...],
                         preferred_element_type=jnp.float32
                         ).astype(o_ref.dtype)


def linear_forward(a, w_bf16, *, tile_t, tile_n):
    T, H = a.shape
    _, n_pad = w_bf16.shape
    assert T % tile_t == 0 and n_pad % tile_n == 0
    return pl.pallas_call(
        _linear_kernel,
        out_shape=jax.ShapeDtypeStruct((T, n_pad), jnp.float32),
        grid_spec=pltpu.PrefetchScalarGridSpec(
            num_scalar_prefetch=0,
            grid=(T // tile_t, n_pad // tile_n),
            in_specs=[
                pl.BlockSpec((tile_t, H), lambda ti, ni: (ti, 0)),
                pl.BlockSpec((H, tile_n), lambda ti, ni: (0, ni)),
            ],
            out_specs=pl.BlockSpec((tile_t, tile_n), lambda ti, ni: (ti, ni)),
        ),
        compiler_params=pltpu.CompilerParams(
            dimension_semantics=("parallel", "parallel")),
    )(a, w_bf16)


# ----------------------------------------------------------------------------
# Full forward (glue in plain JAX: padding, weight prep, reshape).
# ----------------------------------------------------------------------------
def dbs_lstm_forward(x, wih_list, whh_list, b_list, w2, *, hidden_dim):
    num_frames, input_dim = x.shape
    H = hidden_dim

    # Time chunking: multiple of UNROLL, capped at 512.
    if num_frames <= 512:
        t_chunk = ((num_frames + UNROLL - 1) // UNROLL) * UNROLL
    else:
        t_chunk = 512
    T_pad = ((num_frames + t_chunk - 1) // t_chunk) * t_chunk

    x_seq = x.astype(jnp.float32)
    if T_pad != num_frames:
        x_seq = jnp.concatenate(
            [x_seq, jnp.zeros((T_pad - num_frames, input_dim), jnp.float32)], 0)

    # Fused stacked LSTM (single pallas_call).
    h_seq = fused_lstm_forward(
        x_seq, wih_list, whh_list, [b[None, :] for b in b_list],
        hidden_dim=H, t_chunk=t_chunk, unroll=UNROLL)

    # hidden2dbs: pad N to a lane multiple, bf16 weights, T & N tiled.
    n_pad = ((OUT_DIM + 127) // 128) * 128            # 20736 = 162 * 128
    w2_pad = jnp.zeros((H, n_pad), jnp.float32).at[:, :OUT_DIM].set(w2)
    w2_bf16 = w2_pad.astype(jnp.bfloat16)
    tile_t = t_chunk if t_chunk <= 256 else 256       # keeps v7x VMEM happy
    tile_n = 3456                                      # 6 even lane-dense tiles
    out_pad = linear_forward(h_seq, w2_bf16, tile_t=tile_t, tile_n=tile_n)
    return out_pad[:num_frames, :OUT_DIM].reshape(num_frames, NUM_VERTS, 3)


# ----------------------------------------------------------------------------
# Pure-JAX reference (matches PyTorch nn.LSTM + Linear semantics).
# ----------------------------------------------------------------------------
def ref_forward(x, wih_list, whh_list, b_list, w2):
    T = x.shape[0]
    L = len(wih_list)
    H = whh_list[0].shape[0]
    h = [jnp.zeros((H,), jnp.float32) for _ in range(L)]
    c = [jnp.zeros((H,), jnp.float32) for _ in range(L)]
    outs = []
    for t in range(T):
        x_in = x[t]
        for l in range(L):
            gates = x_in @ wih_list[l] + h[l] @ whh_list[l] + b_list[l]
            i_g = jax.nn.sigmoid(gates[0 * H:1 * H])
            f_g = jax.nn.sigmoid(gates[1 * H:2 * H])
            g_g = jnp.tanh(gates[2 * H:3 * H])
            o_g = jax.nn.sigmoid(gates[3 * H:4 * H])
            c[l] = f_g * c[l] + i_g * g_g
            h[l] = o_g * jnp.tanh(c[l])
            x_in = h[l]
        outs.append(h[-1])
    lstm_out = jnp.stack(outs)
    return (lstm_out @ w2).reshape(T, NUM_VERTS, 3)


if __name__ == "__main__":
    input_dim, hidden_dim, num_stacks = 16, 32, 2
    num_frames = 8

    key = jax.random.PRNGKey(0)
    keys = jax.random.split(key, 4 * num_stacks + 2)
    bound = 1.0 / float(jnp.sqrt(hidden_dim))

    # Weights pre-transposed to (in, 4H)/(H, 4H) with PyTorch i,f,g,o order
    # and b = b_ih + b_hh (a real nn.LSTM checkpoint import must transpose).
    wih_list, whh_list, b_list = [], [], []
    kidx = 0
    for l in range(num_stacks):
        in_l = input_dim if l == 0 else hidden_dim
        wih = jax.random.uniform(keys[kidx], (in_l, 4 * hidden_dim),
                                 jnp.float32, -bound, bound); kidx += 1
        whh = jax.random.uniform(keys[kidx], (hidden_dim, 4 * hidden_dim),
                                 jnp.float32, -bound, bound); kidx += 1
        b_ih = jax.random.uniform(keys[kidx], (4 * hidden_dim,),
                                  jnp.float32, -bound, bound); kidx += 1
        b_hh = jax.random.uniform(keys[kidx], (4 * hidden_dim,),
                                  jnp.float32, -bound, bound); kidx += 1
        wih_list.append(wih)
        whh_list.append(whh)
        b_list.append(b_ih + b_hh)

    w2 = jax.random.uniform(keys[kidx], (hidden_dim, OUT_DIM),
                            jnp.float32, -bound, bound); kidx += 1
    x = jax.random.normal(keys[kidx], (num_frames, input_dim), jnp.float32)

    dbs = dbs_lstm_forward(x, wih_list, whh_list, b_list, w2,
                           hidden_dim=hidden_dim)
    dbs = jax.block_until_ready(dbs)

    ref = ref_forward(x, wih_list, whh_list, b_list, w2)
    assert dbs.shape == (num_frames, NUM_VERTS, 3), dbs.shape
    if not bool(jnp.allclose(dbs, ref, atol=2e-2, rtol=2e-2)):
        max_err = float(jnp.max(jnp.abs(dbs - ref)))
        raise AssertionError(f"kernel/reference mismatch, max abs err={max_err}")
    print("KERNEL_OK")
</pallas_src>

<mosaic_0001>
module attributes {stable_mosaic.version = 11 : i64} {
  func.func @_fused_lstm_kernel(%arg0: i32, %arg1: memref<8x16xf32, #tpu.memory_space<vmem>>, %arg2: memref<16x128xf32, #tpu.memory_space<vmem>>, %arg3: memref<32x128xf32, #tpu.memory_space<vmem>>, %arg4: memref<1x128xf32, #tpu.memory_space<vmem>>, %arg5: memref<32x128xf32, #tpu.memory_space<vmem>>, %arg6: memref<32x128xf32, #tpu.memory_space<vmem>>, %arg7: memref<1x128xf32, #tpu.memory_space<vmem>>, %arg8: memref<8x32xf32, #tpu.memory_space<vmem>>, %arg9: memref<2x1x32xf32, #tpu.memory_space<vmem>>, %arg10: memref<2x1x32xf32, #tpu.memory_space<vmem>>, %arg11: memref<8x128xf32, #tpu.memory_space<vmem>>) attributes {dimension_semantics = [#tpu.dimension_semantics<arbitrary>], iteration_bounds = array<i64: 1>, scalar_prefetch = 0 : i64, scratch_operands = 3 : i64, tpu.core_type = #tpu.core_type<tc>, window_params = [{transform_indices = @transform_0, window_bounds = array<i64: 8, 16>}, {pipeline_mode = #tpu.pipeline_mode<synchronous>, transform_indices = @transform_1, window_bounds = array<i64: 16, 128>}, {pipeline_mode = #tpu.pipeline_mode<synchronous>, transform_indices = @transform_2, window_bounds = array<i64: 32, 128>}, {pipeline_mode = #tpu.pipeline_mode<synchronous>, transform_indices = @transform_3, window_bounds = array<i64: 1, 128>}, {pipeline_mode = #tpu.pipeline_mode<synchronous>, transform_indices = @transform_4, window_bounds = array<i64: 32, 128>}, {pipeline_mode = #tpu.pipeline_mode<synchronous>, transform_indices = @transform_5, window_bounds = array<i64: 32, 128>}, {pipeline_mode = #tpu.pipeline_mode<synchronous>, transform_indices = @transform_6, window_bounds = array<i64: 1, 128>}, {transform_indices = @transform_7, window_bounds = array<i64: 8, 32>}]} {
    %c0_i32 = arith.constant 0 : i32
    %0 = arith.cmpi eq, %arg0, %c0_i32 : i32
    %1 = arith.extui %0 : i1 to i32
    %c0_i32_0 = arith.constant 0 : i32
    %2 = arith.cmpi ne, %1, %c0_i32_0 : i32
    scf.if %2 {
      %cst_82 = arith.constant 0.000000e+00 : f32
      %337 = vector.broadcast %cst_82 : f32 to vector<2x1x32xf32>
      %c0_83 = arith.constant 0 : index
      %c0_84 = arith.constant 0 : index
      %c0_85 = arith.constant 0 : index
      %338 = vector.load %arg9[%c0_83, %c0_84, %c0_85] : memref<2x1x32xf32, #tpu.memory_space<vmem>>, vector<2x1x32xf32>
      tpu.vector_store %arg9[%c0_83, %c0_84, %c0_85], %337 {strides = array<i32>} : memref<2x1x32xf32, #tpu.memory_space<vmem>>, vector<2x1x32xf32>,
      %cst_86 = arith.constant 0.000000e+00 : f32
      %339 = vector.broadcast %cst_86 : f32 to vector<2x1x32xf32>
      %c0_87 = arith.constant 0 : index
      %c0_88 = arith.constant 0 : index
      %c0_89 = arith.constant 0 : index
      %340 = vector.load %arg10[%c0_87, %c0_88, %c0_89] : memref<2x1x32xf32, #tpu.memory_space<vmem>>, vector<2x1x32xf32>
      tpu.vector_store %arg10[%c0_87, %c0_88, %c0_89], %339 {strides = array<i32>} : memref<2x1x32xf32, #tpu.memory_space<vmem>>, vector<2x1x32xf32>,
    } else {
    }
    %c0 = arith.constant 0 : index
    %c0_1 = arith.constant 0 : index
    %3 = vector.load %arg1[%c0, %c0_1] : memref<8x16xf32, #tpu.memory_space<vmem>>, vector<8x16xf32>
    %c0_2 = arith.constant 0 : index
    %c0_3 = arith.constant 0 : index
    %4 = vector.load %arg2[%c0_2, %c0_3] : memref<16x128xf32, #tpu.memory_space<vmem>>, vector<16x128xf32>
    %cst = arith.constant dense<0.000000e+00> : vector<8x128xf32>
    %5 = tpu.matmul %3, %4, %cst {dimension_numbers = #tpu.dot_dimension_numbers<[1], [0], [0], [1], [0, 0, 1, 1], [], []>} : vector<8x16xf32>, vector<16x128xf32>, vector<8x128xf32> -> vector<8x128xf32>
    %c0_4 = arith.constant 0 : index
    %c0_5 = arith.constant 0 : index
    %6 = vector.load %arg4[%c0_4, %c0_5] : memref<1x128xf32, #tpu.memory_space<vmem>>, vector<1x128xf32>
    %7 = vector.broadcast %6 : vector<1x128xf32> to vector<8x128xf32>
    %8 = arith.addf %5, %7 : vector<8x128xf32>
    %c0_6 = arith.constant 0 : index
    %c0_7 = arith.constant 0 : index
    %9 = vector.load %arg11[%c0_6, %c0_7] : memref<8x128xf32, #tpu.memory_space<vmem>>, vector<8x128xf32>
    tpu.vector_store %arg11[%c0_6, %c0_7], %8 {strides = array<i32>} : memref<8x128xf32, #tpu.memory_space<vmem>>, vector<8x128xf32>,
    %c0_8 = arith.constant 0 : index
    %c0_9 = arith.constant 0 : index
    %10 = vector.load %arg3[%c0_8, %c0_9] : memref<32x128xf32, #tpu.memory_space<vmem>>, vector<32x128xf32>
    %c0_10 = arith.constant 0 : index
    %c0_11 = arith.constant 0 : index
    %11 = vector.load %arg6[%c0_10, %c0_11] : memref<32x128xf32, #tpu.memory_space<vmem>>, vector<32x128xf32>
    %c0_12 = arith.constant 0 : index
    %c0_13 = arith.constant 0 : index
    %12 = vector.load %arg5[%c0_12, %c0_13] : memref<32x128xf32, #tpu.memory_space<vmem>>, vector<32x128xf32>
    %c0_14 = arith.constant 0 : index
    %c0_15 = arith.constant 0 : index
    %13 = vector.load %arg7[%c0_14, %c0_15] : memref<1x128xf32, #tpu.memory_space<vmem>>, vector<1x128xf32>
    %c0_16 = arith.constant 0 : index
    %c0_17 = arith.constant 0 : index
    %c0_18 = arith.constant 0 : index
    %14 = vector.load %arg9[%c0_16, %c0_17, %c0_18] : memref<2x1x32xf32, #tpu.memory_space<vmem>>, vector<1x1x32xf32>
    %15 = vector.shape_cast %14 : vector<1x1x32xf32> to vector<1x32xf32>
    %c1 = arith.constant 1 : index
    %c0_19 = arith.constant 0 : index
    %c0_20 = arith.constant 0 : index
    %16 = vector.load %arg9[%c1, %c0_19, %c0_20] : memref<2x1x32xf32, #tpu.memory_space<vmem>>, vector<1x1x32xf32>
    %17 = vector.shape_cast %16 : vector<1x1x32xf32> to vector<1x32xf32>
    %c0_21 = arith.constant 0 : index
    %c0_22 = arith.constant 0 : index
    %c0_23 = arith.constant 0 : index
    %18 = vector.load %arg10[%c0_21, %c0_22, %c0_23] : memref<2x1x32xf32, #tpu.memory_space<vmem>>, vector<1x1x32xf32>
    %19 = vector.shape_cast %18 : vector<1x1x32xf32> to vector<1x32xf32>
    %c1_24 = arith.constant 1 : index
    %c0_25 = arith.constant 0 : index
    %c0_26 = arith.constant 0 : index
    %20 = vector.load %arg10[%c1_24, %c0_25, %c0_26] : memref<2x1x32xf32, #tpu.memory_space<vmem>>, vector<1x1x32xf32>
    %21 = vector.shape_cast %20 : vector<1x1x32xf32> to vector<1x32xf32>
    %c0_i32_27 = arith.constant 0 : i32
    %c8_i32 = arith.constant 8 : i32
    %22 = arith.muli %c0_i32_27, %c8_i32 : i32
    %23 = tpu.assume_multiple %22, 8 : i32
    %24 = arith.index_cast %23 : i32 to index
    %c0_28 = arith.constant 0 : index
    %25 = vector.load %arg11[%24, %c0_28] : memref<8x128xf32, #tpu.memory_space<vmem>>, vector<8x128xf32>
    %26 = vector.extract_strided_slice %25 {offsets = [0, 0], sizes = [1, 128], strides = [1, 1]} : vector<8x128xf32> to vector<1x128xf32>
    %cst_29 = arith.constant dense<0.000000e+00> : vector<1x128xf32>
    %27 = tpu.matmul %15, %10, %cst_29 {dimension_numbers = #tpu.dot_dimension_numbers<[1], [0], [0], [1], [0, 0, 1, 1], [], []>} : vector<1x32xf32>, vector<32x128xf32>, vector<1x128xf32> -> vector<1x128xf32>
    %28 = arith.addf %26, %27 : vector<1x128xf32>
    %29 = arith.negf %28 : vector<1x128xf32>
    %30 = math.exp %29 : vector<1x128xf32>
    %cst_30 = arith.constant 1.000000e+00 : f32
    %31 = vector.broadcast %cst_30 : f32 to vector<1x128xf32>
    %32 = arith.addf %31, %30 : vector<1x128xf32>
    %33 = arith.divf %31, %32 : vector<1x128xf32>
    %34 = math.tanh %28 : vector<1x128xf32>
    %35 = vector.extract_strided_slice %33 {offsets = [0, 0], sizes = [1, 32], strides = [1, 1]} : vector<1x128xf32> to vector<1x32xf32>
    %36 = vector.extract_strided_slice %33 {offsets = [0, 32], sizes = [1, 32], strides = [1, 1]} : vector<1x128xf32> to vector<1x32xf32>
    %37 = vector.extract_strided_slice %34 {offsets = [0, 64], sizes = [1, 32], strides = [1, 1]} : vector<1x128xf32> to vector<1x32xf32>
    %38 = vector.extract_strided_slice %33 {offsets = [0, 96], sizes = [1, 32], strides = [1, 1]} : vector<1x128xf32> to vector<1x32xf32>
    %39 = arith.mulf %36, %19 : vector<1x32xf32>
    %40 = arith.mulf %35, %37 : vector<1x32xf32>
    %41 = arith.addf %39, %40 : vector<1x32xf32>
    %42 = math.tanh %41 : vector<1x32xf32>
    %43 = arith.mulf %38, %42 : vector<1x32xf32>
    %cst_31 = arith.constant dense<0.000000e+00> : vector<1x128xf32>
    %44 = tpu.matmul %43, %12, %cst_31 {dimension_numbers = #tpu.dot_dimension_numbers<[1], [0], [0], [1], [0, 0, 1, 1], [], []>} : vector<1x32xf32>, vector<32x128xf32>, vector<1x128xf32> -> vector<1x128xf32>
    %cst_32 = arith.constant dense<0.000000e+00> : vector<1x128xf32>
    %45 = tpu.matmul %17, %11, %cst_32 {dimension_numbers = #tpu.dot_dimension_numbers<[1], [0], [0], [1], [0, 0, 1, 1], [], []>} : vector<1x32xf32>, vector<32x128xf32>, vector<1x128xf32> -> vector<1x128xf32>
    %46 = arith.addf %44, %45 : vector<1x128xf32>
    %47 = arith.addf %46, %13 : vector<1x128xf32>
    %48 = arith.negf %47 : vector<1x128xf32>
    %49 = math.exp %48 : vector<1x128xf32>
    %cst_33 = arith.constant 1.000000e+00 : f32
    %50 = vector.broadcast %cst_33 : f32 to vector<1x128xf32>
    %51 = arith.addf %50, %49 : vector<1x128xf32>
    %52 = arith.divf %50, %51 : vector<1x128xf32>
    %53 = math.tanh %47 : vector<1x128xf32>
    %54 = vector.extract_strided_slice %52 {offsets = [0, 0], sizes = [1, 32], strides = [1, 1]} : vector<1x128xf32> to vector<1x32xf32>
    %55 = vector.extract_strided_slice %52 {offsets = [0, 32], sizes = [1, 32], strides = [1, 1]} : vector<1x128xf32> to vector<1x32xf32>
    %56 = vector.extract_strided_slice %53 {offsets = [0, 64], sizes = [1, 32], strides = [1, 1]} : vector<1x128xf32> to vector<1x32xf32>
    %57 = vector.extract_strided_slice %52 {offsets = [0, 96], sizes = [1, 32], strides = [1, 1]} : vector<1x128xf32> to vector<1x32xf32>
    %58 = arith.mulf %55, %21 : vector<1x32xf32>
    %59 = arith.mulf %54, %56 : vector<1x32xf32>
    %60 = arith.addf %58, %59 : vector<1x32xf32>
    %61 = math.tanh %60 : vector<1x32xf32>
    %62 = arith.mulf %57, %61 : vector<1x32xf32>
    %63 = vector.extract_strided_slice %25 {offsets = [1, 0], sizes = [1, 128], strides = [1, 1]} : vector<8x128xf32> to vector<1x128xf32>
    %cst_34 = arith.constant dense<0.000000e+00> : vector<1x128xf32>
    %64 = tpu.matmul %43, %10, %cst_34 {dimension_numbers = #tpu.dot_dimension_numbers<[1], [0], [0], [1], [0, 0, 1, 1], [], []>} : vector<1x32xf32>, vector<32x128xf32>, vector<1x128xf32> -> vector<1x128xf32>
    %65 = arith.addf %63, %64 : vector<1x128xf32>
    %66 = arith.negf %65 : vector<1x128xf32>
    %67 = math.exp %66 : vector<1x128xf32>
    %cst_35 = arith.constant 1.000000e+00 : f32
    %68 = vector.broadcast %cst_35 : f32 to vector<1x128xf32>
    %69 = arith.addf %68, %67 : vector<1x128xf32>
    %70 = arith.divf %68, %69 : vector<1x128xf32>
    %71 = math.tanh %65 : vector<1x128xf32>
    %72 = vector.extract_strided_slice %70 {offsets = [0, 0], sizes = [1, 32], strides = [1, 1]} : vector<1x128xf32> to vector<1x32xf32>
    %73 = vector.extract_strided_slice %70 {offsets = [0, 32], sizes = [1, 32], strides = [1, 1]} : vector<1x128xf32> to vector<1x32xf32>
    %74 = vector.extract_strided_slice %71 {offsets = [0, 64], sizes = [1, 32], strides = [1, 1]} : vector<1x128xf32> to vector<1x32xf32>
    %75 = vector.extract_strided_slice %70 {offsets = [0, 96], sizes = [1, 32], strides = [1, 1]} : vector<1x128xf32> to vector<1x32xf32>
    %76 = arith.mulf %73, %41 : vector<1x32xf32>
    %77 = arith.mulf %72, %74 : vector<1x32xf32>
    %78 = arith.addf %76, %77 : vector<1x32xf32>
    %79 = math.tanh %78 : vector<1x32xf32>
    %80 = arith.mulf %75, %79 : vector<1x32xf32>
    %cst_36 = arith.constant dense<0.000000e+00> : vector<1x128xf32>
    %81 = tpu.matmul %80, %12, %cst_36 {dimension_numbers = #tpu.dot_dimension_numbers<[1], [0], [0], [1], [0, 0, 1, 1], [], []>} : vector<1x32xf32>, vector<32x128xf32>, vector<1x128xf32> -> vector<1x128xf32>
    %cst_37 = arith.constant dense<0.000000e+00> : vector<1x128xf32>
    %82 = tpu.matmul %62, %11, %cst_37 {dimension_numbers = #tpu.dot_dimension_numbers<[1], [0], [0], [1], [0, 0, 1, 1], [], []>} : vector<1x32xf32>, vector<32x128xf32>, vector<1x128xf32> -> vector<1x128xf32>
    %83 = arith.addf %81, %82 : vector<1x128xf32>
    %84 = arith.addf %83, %13 : vector<1x128xf32>
    %85 = arith.negf %84 : vector<1x128xf32>
    %86 = math.exp %85 : vector<1x128xf32>
    %cst_38 = arith.constant 1.000000e+00 : f32
    %87 = vector.broadcast %cst_38 : f32 to vector<1x128xf32>
    %88 = arith.addf %87, %86 : vector<1x128xf32>
    %89 = arith.divf %87, %88 : vector<1x128xf32>
    %90 = math.tanh %84 : vector<1x128xf32>
    %91 = vector.extract_strided_slice %89 {offsets = [0, 0], sizes = [1, 32], strides = [1, 1]} : vector<1x128xf32> to vector<1x32xf32>
    %92 = vector.extract_strided_slice %89 {offsets = [0, 32], sizes = [1, 32], strides = [1, 1]} : vector<1x128xf32> to vector<1x32xf32>
    %93 = vector.extract_strided_slice %90 {offsets = [0, 64], sizes = [1, 32], strides = [1, 1]} : vector<1x128xf32> to vector<1x32xf32>
    %94 = vector.extract_strided_slice %89 {offsets = [0, 96], sizes = [1, 32], strides = [1, 1]} : vector<1x128xf32> to vector<1x32xf32>
    %95 = arith.mulf %92, %60 : vector<1x32xf32>
    %96 = arith.mulf %91, %93 : vector<1x32xf32>
    %97 = arith.addf %95, %96 : vector<1x32xf32>
    %98 = math.tanh %97 : vector<1x32xf32>
    %99 = arith.mulf %94, %98 : vector<1x32xf32>
    %100 = vector.extract_strided_slice %25 {offsets = [2, 0], sizes = [1, 128], strides = [1, 1]} : vector<8x128xf32> to vector<1x128xf32>
    %cst_39 = arith.constant dense<0.000000e+00> : vector<1x128xf32>
    %101 = tpu.matmul %80, %10, %cst_39 {dimension_numbers = #tpu.dot_dimension_numbers<[1], [0], [0], [1], [0, 0, 1, 1], [], []>} : vector<1x32xf32>, vector<32x128xf32>, vector<1x128xf32> -> vector<1x128xf32>
    %102 = arith.addf %100, %101 : vector<1x128xf32>
    %103 = arith.negf %102 : vector<1x128xf32>
    %104 = math.exp %103 : vector<1x128xf32>
    %cst_40 = arith.constant 1.000000e+00 : f32
    %105 = vector.broadcast %cst_40 : f32 to vector<1x128xf32>
    %106 = arith.addf %105, %104 : vector<1x128xf32>
    %107 = arith.divf %105, %106 : vector<1x128xf32>
    %108 = math.tanh %102 : vector<1x128xf32>
    %109 = vector.extract_strided_slice %107 {offsets = [0, 0], sizes = [1, 32], strides = [1, 1]} : vector<1x128xf32> to vector<1x32xf32>
    %110 = vector.extract_strided_slice %107 {offsets = [0, 32], sizes = [1, 32], strides = [1, 1]} : vector<1x128xf32> to vector<1x32xf32>
    %111 = vector.extract_strided_slice %108 {offsets = [0, 64], sizes = [1, 32], strides = [1, 1]} : vector<1x128xf32> to vector<1x32xf32>
    %112 = vector.extract_strided_slice %107 {offsets = [0, 96], sizes = [1, 32], strides = [1, 1]} : vector<1x128xf32> to vector<1x32xf32>
    %113 = arith.mulf %110, %78 : vector<1x32xf32>
    %114 = arith.mulf %109, %111 : vector<1x32xf32>
    %115 = arith.addf %113, %114 : vector<1x32xf32>
    %116 = math.tanh %115 : vector<1x32xf32>
    %117 = arith.mulf %112, %116 : vector<1x32xf32>
    %cst_41 = arith.constant dense<0.000000e+00> : vector<1x128xf32>
    %118 = tpu.matmul %117, %12, %cst_41 {dimension_numbers = #tpu.dot_dimension_numbers<[1], [0], [0], [1], [0, 0, 1, 1], [], []>} : vector<1x32xf32>, vector<32x128xf32>, vector<1x128xf32> -> vector<1x128xf32>
    %cst_42 = arith.constant dense<0.000000e+00> : vector<1x128xf32>
    %119 = tpu.matmul %99, %11, %cst_42 {dimension_numbers = #tpu.dot_dimension_numbers<[1], [0], [0], [1], [0, 0, 1, 1], [], []>} : vector<1x32xf32>, vector<32x128xf32>, vector<1x128xf32> -> vector<1x128xf32>
    %120 = arith.addf %118, %119 : vector<1x128xf32>
    %121 = arith.addf %120, %13 : vector<1x128xf32>
    %122 = arith.negf %121 : vector<1x128xf32>
    %123 = math.exp %122 : vector<1x128xf32>
    %cst_43 = arith.constant 1.000000e+00 : f32
    %124 = vector.broadcast %cst_43 : f32 to vector<1x128xf32>
    %125 = arith.addf %124, %123 : vector<1x128xf32>
    %126 = arith.divf %124, %125 : vector<1x128xf32>
    %127 = math.tanh %121 : vector<1x128xf32>
    %128 = vector.extract_strided_slice %126 {offsets = [0, 0], sizes = [1, 32], strides = [1, 1]} : vector<1x128xf32> to vector<1x32xf32>
    %129 = vector.extract_strided_slice %126 {offsets = [0, 32], sizes = [1, 32], strides = [1, 1]} : vector<1x128xf32> to vector<1x32xf32>
    %130 = vector.extract_strided_slice %127 {offsets = [0, 64], sizes = [1, 32], strides = [1, 1]} : vector<1x128xf32> to vector<1x32xf32>
    %131 = vector.extract_strided_slice %126 {offsets = [0, 96], sizes = [1, 32], strides = [1, 1]} : vector<1x128xf32> to vector<1x32xf32>
    %132 = arith.mulf %129, %97 : vector<1x32xf32>
    %133 = arith.mulf %128, %130 : vector<1x32xf32>
    %134 = arith.addf %132, %133 : vector<1x32xf32>
    %135 = math.tanh %134 : vector<1x32xf32>
    %136 = arith.mulf %131, %135 : vector<1x32xf32>
    %137 = vector.extract_strided_slice %25 {offsets = [3, 0], sizes = [1, 128], strides = [1, 1]} : vector<8x128xf32> to vector<1x128xf32>
    %cst_44 = arith.constant dense<0.000000e+00> : vector<1x128xf32>
    %138 = tpu.matmul %117, %10, %cst_44 {dimension_numbers = #tpu.dot_dimension_numbers<[1], [0], [0], [1], [0, 0, 1, 1], [], []>} : vector<1x32xf32>, vector<32x128xf32>, vector<1x128xf32> -> vector<1x128xf32>
    %139 = arith.addf %137, %138 : vector<1x128xf32>
    %140 = arith.negf %139 : vector<1x128xf32>
    %141 = math.exp %140 : vector<1x128xf32>
    %cst_45 = arith.constant 1.000000e+00 : f32
    %142 = vector.broadcast %cst_45 : f32 to vector<1x128xf32>
    %143 = arith.addf %142, %141 : vector<1x128xf32>
    %144 = arith.divf %142, %143 : vector<1x128xf32>
    %145 = math.tanh %139 : vector<1x128xf32>
    %146 = vector.extract_strided_slice %144 {offsets = [0, 0], sizes = [1, 32], strides = [1, 1]} : vector<1x128xf32> to vector<1x32xf32>
    %147 = vector.extract_strided_slice %144 {offsets = [0, 32], sizes = [1, 32], strides = [1, 1]} : vector<1x128xf32> to vector<1x32xf32>
    %148 = vector.extract_strided_slice %145 {offsets = [0, 64], sizes = [1, 32], strides = [1, 1]} : vector<1x128xf32> to vector<1x32xf32>
    %149 = vector.extract_strided_slice %144 {offsets = [0, 96], sizes = [1, 32], strides = [1, 1]} : vector<1x128xf32> to vector<1x32xf32>
    %150 = arith.mulf %147, %115 : vector<1x32xf32>
    %151 = arith.mulf %146, %148 : vector<1x32xf32>
    %152 = arith.addf %150, %151 : vector<1x32xf32>
    %153 = math.tanh %152 : vector<1x32xf32>
    %154 = arith.mulf %149, %153 : vector<1x32xf32>
    %cst_46 = arith.constant dense<0.000000e+00> : vector<1x128xf32>
    %155 = tpu.matmul %154, %12, %cst_46 {dimension_numbers = #tpu.dot_dimension_numbers<[1], [0], [0], [1], [0, 0, 1, 1], [], []>} : vector<1x32xf32>, vector<32x128xf32>, vector<1x128xf32> -> vector<1x128xf32>
    %cst_47 = arith.constant dense<0.000000e+00> : vector<1x128xf32>
    %156 = tpu.matmul %136, %11, %cst_47 {dimension_numbers = #tpu.dot_dimension_numbers<[1], [0], [0], [1], [0, 0, 1, 1], [], []>} : vector<1x32xf32>, vector<32x128xf32>, vector<1x128xf32> -> vector<1x128xf32>
    %157 = arith.addf %155, %156 : vector<1x128xf32>
    %158 = arith.addf %157, %13 : vector<1x128xf32>
    %159 = arith.negf %158 : vector<1x128xf32>
    %160 = math.exp %159 : vector<1x128xf32>
    %cst_48 = arith.constant 1.000000e+00 : f32
    %161 = vector.broadcast %cst_48 : f32 to vector<1x128xf32>
    %162 = arith.addf %161, %160 : vector<1x128xf32>
    %163 = arith.divf %161, %162 : vector<1x128xf32>
    %164 = math.tanh %158 : vector<1x128xf32>
    %165 = vector.extract_strided_slice %163 {offsets = [0, 0], sizes = [1, 32], strides = [1, 1]} : vector<1x128xf32> to vector<1x32xf32>
    %166 = vector.extract_strided_slice %163 {offsets = [0, 32], sizes = [1, 32], strides = [1, 1]} : vector<1x128xf32> to vector<1x32xf32>
    %167 = vector.extract_strided_slice %164 {offsets = [0, 64], sizes = [1, 32], strides = [1, 1]} : vector<1x128xf32> to vector<1x32xf32>
    %168 = vector.extract_strided_slice %163 {offsets = [0, 96], sizes = [1, 32], strides = [1, 1]} : vector<1x128xf32> to vector<1x32xf32>
    %169 = arith.mulf %166, %134 : vector<1x32xf32>
    %170 = arith.mulf %165, %167 : vector<1x32xf32>
    %171 = arith.addf %169, %170 : vector<1x32xf32>
    %172 = math.tanh %171 : vector<1x32xf32>
    %173 = arith.mulf %168, %172 : vector<1x32xf32>
    %174 = vector.extract_strided_slice %25 {offsets = [4, 0], sizes = [1, 128], strides = [1, 1]} : vector<8x128xf32> to vector<1x128xf32>
    %cst_49 = arith.constant dense<0.000000e+00> : vector<1x128xf32>
    %175 = tpu.matmul %154, %10, %cst_49 {dimension_numbers = #tpu.dot_dimension_numbers<[1], [0], [0], [1], [0, 0, 1, 1], [], []>} : vector<1x32xf32>, vector<32x128xf32>, vector<1x128xf32> -> vector<1x128xf32>
    %176 = arith.addf %174, %175 : vector<1x128xf32>
    %177 = arith.negf %176 : vector<1x128xf32>
    %178 = math.exp %177 : vector<1x128xf32>
    %cst_50 = arith.constant 1.000000e+00 : f32
    %179 = vector.broadcast %cst_50 : f32 to vector<1x128xf32>
    %180 = arith.addf %179, %178 : vector<1x128xf32>
    %181 = arith.divf %179, %180 : vector<1x128xf32>
    %182 = math.tanh %176 : vector<1x128xf32>
    %183 = vector.extract_strided_slice %181 {offsets = [0, 0], sizes = [1, 32], strides = [1, 1]} : vector<1x128xf32> to vector<1x32xf32>
    %184 = vector.extract_strided_slice %181 {offsets = [0, 32], sizes = [1, 32], strides = [1, 1]} : vector<1x128xf32> to vector<1x32xf32>
    %185 = vector.extract_strided_slice %182 {offsets = [0, 64], sizes = [1, 32], strides = [1, 1]} : vector<1x128xf32> to vector<1x32xf32>
    %186 = vector.extract_strided_slice %181 {offsets = [0, 96], sizes = [1, 32], strides = [1, 1]} : vector<1x128xf32> to vector<1x32xf32>
    %187 = arith.mulf %184, %152 : vector<1x32xf32>
    %188 = arith.mulf %183, %185 : vector<1x32xf32>
    %189 = arith.addf %187, %188 : vector<1x32xf32>
    %190 = math.tanh %189 : vector<1x32xf32>
    %191 = arith.mulf %186, %190 : vector<1x32xf32>
    %cst_51 = arith.constant dense<0.000000e+00> : vector<1x128xf32>
    %192 = tpu.matmul %191, %12, %cst_51 {dimension_numbers = #tpu.dot_dimension_numbers<[1], [0], [0], [1], [0, 0, 1, 1], [], []>} : vector<1x32xf32>, vector<32x128xf32>, vector<1x128xf32> -> vector<1x128xf32>
    %cst_52 = arith.constant dense<0.000000e+00> : vector<1x128xf32>
    %193 = tpu.matmul %173, %11, %cst_52 {dimension_numbers = #tpu.dot_dimension_numbers<[1], [0], [0], [1], [0, 0, 1, 1], [], []>} : vector<1x32xf32>, vector<32x128xf32>, vector<1x128xf32> -> vector<1x128xf32>
    %194 = arith.addf %192, %193 : vector<1x128xf32>
    %195 = arith.addf %194, %13 : vector<1x128xf32>
    %196 = arith.negf %195 : vector<1x128xf32>
    %197 = math.exp %196 : vector<1x128xf32>
    %cst_53 = arith.constant 1.000000e+00 : f32
    %198 = vector.broadcast %cst_53 : f32 to vector<1x128xf32>
    %199 = arith.addf %198, %197 : vector<1x128xf32>
    %200 = arith.divf %198, %199 : vector<1x128xf32>
    %201 = math.tanh %195 : vector<1x128xf32>
    %202 = vector.extract_strided_slice %200 {offsets = [0, 0], sizes = [1, 32], strides = [1, 1]} : vector<1x128xf32> to vector<1x32xf32>
    %203 = vector.extract_strided_slice %200 {offsets = [0, 32], sizes = [1, 32], strides = [1, 1]} : vector<1x128xf32> to vector<1x32xf32>
    %204 = vector.extract_strided_slice %201 {offsets = [0, 64], sizes = [1, 32], strides = [1, 1]} : vector<1x128xf32> to vector<1x32xf32>
    %205 = vector.extract_strided_slice %200 {offsets = [0, 96], sizes = [1, 32], strides = [1, 1]} : vector<1x128xf32> to vector<1x32xf32>
    %206 = arith.mulf %203, %171 : vector<1x32xf32>
    %207 = arith.mulf %202, %204 : vector<1x32xf32>
    %208 = arith.addf %206, %207 : vector<1x32xf32>
    %209 = math.tanh %208 : vector<1x32xf32>
    %210 = arith.mulf %205, %209 : vector<1x32xf32>
    %211 = vector.extract_strided_slice %25 {offsets = [5, 0], sizes = [1, 128], strides = [1, 1]} : vector<8x128xf32> to vector<1x128xf32>
    %cst_54 = arith.constant dense<0.000000e+00> : vector<1x128xf32>
    %212 = tpu.matmul %191, %10, %cst_54 {dimension_numbers = #tpu.dot_dimension_numbers<[1], [0], [0], [1], [0, 0, 1, 1], [], []>} : vector<1x32xf32>, vector<32x128xf32>, vector<1x128xf32> -> vector<1x128xf32>
    %213 = arith.addf %211, %212 : vector<1x128xf32>
    %214 = arith.negf %213 : vector<1x128xf32>
    %215 = math.exp %214 : vector<1x128xf32>
    %cst_55 = arith.constant 1.000000e+00 : f32
    %216 = vector.broadcast %cst_55 : f32 to vector<1x128xf32>
    %217 = arith.addf %216, %215 : vector<1x128xf32>
    %218 = arith.divf %216, %217 : vector<1x128xf32>
    %219 = math.tanh %213 : vector<1x128xf32>
    %220 = vector.extract_strided_slice %218 {offsets = [0, 0], sizes = [1, 32], strides = [1, 1]} : vector<1x128xf32> to vector<1x32xf32>
    %221 = vector.extract_strided_slice %218 {offsets = [0, 32], sizes = [1, 32], strides = [1, 1]} : vector<1x128xf32> to vector<1x32xf32>
    %222 = vector.extract_strided_slice %219 {offsets = [0, 64], sizes = [1, 32], strides = [1, 1]} : vector<1x128xf32> to vector<1x32xf32>
    %223 = vector.extract_strided_slice %218 {offsets = [0, 96], sizes = [1, 32], strides = [1, 1]} : vector<1x128xf32> to vector<1x32xf32>
    %224 = arith.mulf %221, %189 : vector<1x32xf32>
    %225 = arith.mulf %220, %222 : vector<1x32xf32>
    %226 = arith.addf %224, %225 : vector<1x32xf32>
    %227 = math.tanh %226 : vector<1x32xf32>
    %228 = arith.mulf %223, %227 : vector<1x32xf32>
    %cst_56 = arith.constant dense<0.000000e+00> : vector<1x128xf32>
    %229 = tpu.matmul %228, %12, %cst_56 {dimension_numbers = #tpu.dot_dimension_numbers<[1], [0], [0], [1], [0, 0, 1, 1], [], []>} : vector<1x32xf32>, vector<32x128xf32>, vector<1x128xf32> -> vector<1x128xf32>
    %cst_57 = arith.constant dense<0.000000e+00> : vector<1x128xf32>
    %230 = tpu.matmul %210, %11, %cst_57 {dimension_numbers = #tpu.dot_dimension_numbers<[1], [0], [0], [1], [0, 0, 1, 1], [], []>} : vector<1x32xf32>, vector<32x128xf32>, vector<1x128xf32> -> vector<1x128xf32>
    %231 = arith.addf %229, %230 : vector<1x128xf32>
    %232 = arith.addf %231, %13 : vector<1x128xf32>
    %233 = arith.negf %232 : vector<1x128xf32>
    %234 = math.exp %233 : vector<1x128xf32>
    %cst_58 = arith.constant 1.000000e+00 : f32
    %235 = vector.broadcast %cst_58 : f32 to vector<1x128xf32>
    %236 = arith.addf %235, %234 : vector<1x128xf32>
    %237 = arith.divf %235, %236 : vector<1x128xf32>
    %238 = math.tanh %232 : vector<1x128xf32>
    %239 = vector.extract_strided_slice %237 {offsets = [0, 0], sizes = [1, 32], strides = [1, 1]} : vector<1x128xf32> to vector<1x32xf32>
    %240 = vector.extract_strided_slice %237 {offsets = [0, 32], sizes = [1, 32], strides = [1, 1]} : vector<1x128xf32> to vector<1x32xf32>
    %241 = vector.extract_strided_slice %238 {offsets = [0, 64], sizes = [1, 32], strides = [1, 1]} : vector<1x128xf32> to vector<1x32xf32>
    %242 = vector.extract_strided_slice %237 {offsets = [0, 96], sizes = [1, 32], strides = [1, 1]} : vector<1x128xf32> to vector<1x32xf32>
    %243 = arith.mulf %240, %208 : vector<1x32xf32>
    %244 = arith.mulf %239, %241 : vector<1x32xf32>
    %245 = arith.addf %243, %244 : vector<1x32xf32>
    %246 = math.tanh %245 : vector<1x32xf32>
    %247 = arith.mulf %242, %246 : vector<1x32xf32>
    %248 = vector.extract_strided_slice %25 {offsets = [6, 0], sizes = [1, 128], strides = [1, 1]} : vector<8x128xf32> to vector<1x128xf32>
    %cst_59 = arith.constant dense<0.000000e+00> : vector<1x128xf32>
    %249 = tpu.matmul %228, %10, %cst_59 {dimension_numbers = #tpu.dot_dimension_numbers<[1], [0], [0], [1], [0, 0, 1, 1], [], []>} : vector<1x32xf32>, vector<32x128xf32>, vector<1x128xf32> -> vector<1x128xf32>
    %250 = arith.addf %248, %249 : vector<1x128xf32>
    %251 = arith.negf %250 : vector<1x128xf32>
    %252 = math.exp %251 : vector<1x128xf32>
    %cst_60 = arith.constant 1.000000e+00 : f32
    %253 = vector.broadcast %cst_60 : f32 to vector<1x128xf32>
    %254 = arith.addf %253, %252 : vector<1x128xf32>
    %255 = arith.divf %253, %254 : vector<1x128xf32>
    %256 = math.tanh %250 : vector<1x128xf32>
    %257 = vector.extract_strided_slice %255 {offsets = [0, 0], sizes = [1, 32], strides = [1, 1]} : vector<1x128xf32> to vector<1x32xf32>
    %258 = vector.extract_strided_slice %255 {offsets = [0, 32], sizes = [1, 32], strides = [1, 1]} : vector<1x128xf32> to vector<1x32xf32>
    %259 = vector.extract_strided_slice %256 {offsets = [0, 64], sizes = [1, 32], strides = [1, 1]} : vector<1x128xf32> to vector<1x32xf32>
    %260 = vector.extract_strided_slice %255 {offsets = [0, 96], sizes = [1, 32], strides = [1, 1]} : vector<1x128xf32> to vector<1x32xf32>
    %261 = arith.mulf %258, %226 : vector<1x32xf32>
    %262 = arith.mulf %257, %259 : vector<1x32xf32>
    %263 = arith.addf %261, %262 : vector<1x32xf32>
    %264 = math.tanh %263 : vector<1x32xf32>
    %265 = arith.mulf %260, %264 : vector<1x32xf32>
    %cst_61 = arith.constant dense<0.000000e+00> : vector<1x128xf32>
    %266 = tpu.matmul %265, %12, %cst_61 {dimension_numbers = #tpu.dot_dimension_numbers<[1], [0], [0], [1], [0, 0, 1, 1], [], []>} : vector<1x32xf32>, vector<32x128xf32>, vector<1x128xf32> -> vector<1x128xf32>
    %cst_62 = arith.constant dense<0.000000e+00> : vector<1x128xf32>
    %267 = tpu.matmul %247, %11, %cst_62 {dimension_numbers = #tpu.dot_dimension_numbers<[1], [0], [0], [1], [0, 0, 1, 1], [], []>} : vector<1x32xf32>, vector<32x128xf32>, vector<1x128xf32> -> vector<1x128xf32>
    %268 = arith.addf %266, %267 : vector<1x128xf32>
    %269 = arith.addf %268, %13 : vector<1x128xf32>
    %270 = arith.negf %269 : vector<1x128xf32>
    %271 = math.exp %270 : vector<1x128xf32>
    %cst_63 = arith.constant 1.000000e+00 : f32
    %272 = vector.broadcast %cst_63 : f32 to vector<1x128xf32>
    %273 = arith.addf %272, %271 : vector<1x128xf32>
    %274 = arith.divf %272, %273 : vector<1x128xf32>
    %275 = math.tanh %269 : vector<1x128xf32>
    %276 = vector.extract_strided_slice %274 {offsets = [0, 0], sizes = [1, 32], strides = [1, 1]} : vector<1x128xf32> to vector<1x32xf32>
    %277 = vector.extract_strided_slice %274 {offsets = [0, 32], sizes = [1, 32], strides = [1, 1]} : vector<1x128xf32> to vector<1x32xf32>
    %278 = vector.extract_strided_slice %275 {offsets = [0, 64], sizes = [1, 32], strides = [1, 1]} : vector<1x128xf32> to vector<1x32xf32>
    %279 = vector.extract_strided_slice %274 {offsets = [0, 96], sizes = [1, 32], strides = [1, 1]} : vector<1x128xf32> to vector<1x32xf32>
    %280 = arith.mulf %277, %245 : vector<1x32xf32>
    %281 = arith.mulf %276, %278 : vector<1x32xf32>
    %282 = arith.addf %280, %281 : vector<1x32xf32>
    %283 = math.tanh %282 : vector<1x32xf32>
    %284 = arith.mulf %279, %283 : vector<1x32xf32>
    %285 = vector.extract_strided_slice %25 {offsets = [7, 0], sizes = [1, 128], strides = [1, 1]} : vector<8x128xf32> to vector<1x128xf32>
    %cst_64 = arith.constant dense<0.000000e+00> : vector<1x128xf32>
    %286 = tpu.matmul %265, %10, %cst_64 {dimension_numbers = #tpu.dot_dimension_numbers<[1], [0], [0], [1], [0, 0, 1, 1], [], []>} : vector<1x32xf32>, vector<32x128xf32>, vector<1x128xf32> -> vector<1x128xf32>
    %287 = arith.addf %285, %286 : vector<1x128xf32>
    %288 = arith.negf %287 : vector<1x128xf32>
    %289 = math.exp %288 : vector<1x128xf32>
    %cst_65 = arith.constant 1.000000e+00 : f32
    %290 = vector.broadcast %cst_65 : f32 to vector<1x128xf32>
    %291 = arith.addf %290, %289 : vector<1x128xf32>
    %292 = arith.divf %290, %291 : vector<1x128xf32>
    %293 = math.tanh %287 : vector<1x128xf32>
    %294 = vector.extract_strided_slice %292 {offsets = [0, 0], sizes = [1, 32], strides = [1, 1]} : vector<1x128xf32> to vector<1x32xf32>
    %295 = vector.extract_strided_slice %292 {offsets = [0, 32], sizes = [1, 32], strides = [1, 1]} : vector<1x128xf32> to vector<1x32xf32>
    %296 = vector.extract_strided_slice %293 {offsets = [0, 64], sizes = [1, 32], strides = [1, 1]} : vector<1x128xf32> to vector<1x32xf32>
    %297 = vector.extract_strided_slice %292 {offsets = [0, 96], sizes = [1, 32], strides = [1, 1]} : vector<1x128xf32> to vector<1x32xf32>
    %298 = arith.mulf %295, %263 : vector<1x32xf32>
    %299 = arith.mulf %294, %296 : vector<1x32xf32>
    %300 = arith.addf %298, %299 : vector<1x32xf32>
    %301 = math.tanh %300 : vector<1x32xf32>
    %302 = arith.mulf %297, %301 : vector<1x32xf32>
    %cst_66 = arith.constant dense<0.000000e+00> : vector<1x128xf32>
    %303 = tpu.matmul %302, %12, %cst_66 {dimension_numbers = #tpu.dot_dimension_numbers<[1], [0], [0], [1], [0, 0, 1, 1], [], []>} : vector<1x32xf32>, vector<32x128xf32>, vector<1x128xf32> -> vector<1x128xf32>
    %cst_67 = arith.constant dense<0.000000e+00> : vector<1x128xf32>
    %304 = tpu.matmul %284, %11, %cst_67 {dimension_numbers = #tpu.dot_dimension_numbers<[1], [0], [0], [1], [0, 0, 1, 1], [], []>} : vector<1x32xf32>, vector<32x128xf32>, vector<1x128xf32> -> vector<1x128xf32>
    %305 = arith.addf %303, %304 : vector<1x128xf32>
    %306 = arith.addf %305, %13 : vector<1x128xf32>
    %307 = arith.negf %306 : vector<1x128xf32>
    %308 = math.exp %307 : vector<1x128xf32>
    %cst_68 = arith.constant 1.000000e+00 : f32
    %309 = vector.broadcast %cst_68 : f32 to vector<1x128xf32>
    %310 = arith.addf %309, %308 : vector<1x128xf32>
    %311 = arith.divf %309, %310 : vector<1x128xf32>
    %312 = math.tanh %306 : vector<1x128xf32>
    %313 = vector.extract_strided_slice %311 {offsets = [0, 0], sizes = [1, 32], strides = [1, 1]} : vector<1x128xf32> to vector<1x32xf32>
    %314 = vector.extract_strided_slice %311 {offsets = [0, 32], sizes = [1, 32], strides = [1, 1]} : vector<1x128xf32> to vector<1x32xf32>
    %315 = vector.extract_strided_slice %312 {offsets = [0, 64], sizes = [1, 32], strides = [1, 1]} : vector<1x128xf32> to vector<1x32xf32>
    %316 = vector.extract_strided_slice %311 {offsets = [0, 96], sizes = [1, 32], strides = [1, 1]} : vector<1x128xf32> to vector<1x32xf32>
    %317 = arith.mulf %314, %282 : vector<1x32xf32>
    %318 = arith.mulf %313, %315 : vector<1x32xf32>
    %319 = arith.addf %317, %318 : vector<1x32xf32>
    %320 = math.tanh %319 : vector<1x32xf32>
    %321 = arith.mulf %316, %320 : vector<1x32xf32>
    %322 = tpu.concatenate %62, %99, %136, %173, %210, %247, %284, %321 in 0 : vector<1x32xf32>, vector<1x32xf32>, vector<1x32xf32>, vector<1x32xf32>, vector<1x32xf32>, vector<1x32xf32>, vector<1x32xf32>, vector<1x32xf32> -> vector<8x32xf32>
    %323 = arith.index_cast %23 : i32 to index
    %c0_69 = arith.constant 0 : index
    %324 = vector.load %arg8[%323, %c0_69] : memref<8x32xf32, #tpu.memory_space<vmem>>, vector<8x32xf32>
    tpu.vector_store %arg8[%323, %c0_69], %322 {strides = array<i32>} : memref<8x32xf32, #tpu.memory_space<vmem>>, vector<8x32xf32>,
    %c1_i32 = arith.constant 1 : i32
    %c0_70 = arith.constant 0 : index
    %c0_71 = arith.constant 0 : index
    %c0_72 = arith.constant 0 : index
    %325 = vector.load %arg9[%c0_70, %c0_71, %c0_72] : memref<2x1x32xf32, #tpu.memory_space<vmem>>, vector<1x1x32xf32>
    %326 = vector.shape_cast %325 : vector<1x1x32xf32> to vector<1x32xf32>
    %327 = vector.shape_cast %302 : vector<1x32xf32> to vector<1x1x32xf32>
    tpu.vector_store %arg9[%c0_70, %c0_71, %c0_72], %327 {strides = array<i32>} : memref<2x1x32xf32, #tpu.memory_space<vmem>>, vector<1x1x32xf32>,
    %c0_73 = arith.constant 0 : index
    %c0_74 = arith.constant 0 : index
    %c0_75 = arith.constant 0 : index
    %328 = vector.load %arg10[%c0_73, %c0_74, %c0_75] : memref<2x1x32xf32, #tpu.memory_space<vmem>>, vector<1x1x32xf32>
    %329 = vector.shape_cast %328 : vector<1x1x32xf32> to vector<1x32xf32>
    %330 = vector.shape_cast %300 : vector<1x32xf32> to vector<1x1x32xf32>
    tpu.vector_store %arg10[%c0_73, %c0_74, %c0_75], %330 {strides = array<i32>} : memref<2x1x32xf32, #tpu.memory_space<vmem>>, vector<1x1x32xf32>,
    %c1_76 = arith.constant 1 : index
    %c0_77 = arith.constant 0 : index
    %c0_78 = arith.constant 0 : index
    %331 = vector.load %arg9[%c1_76, %c0_77, %c0_78] : memref<2x1x32xf32, #tpu.memory_space<vmem>>, vector<1x1x32xf32>
    %332 = vector.shape_cast %331 : vector<1x1x32xf32> to vector<1x32xf32>
    %333 = vector.shape_cast %321 : vector<1x32xf32> to vector<1x1x32xf32>
    tpu.vector_store %arg9[%c1_76, %c0_77, %c0_78], %333 {strides = array<i32>} : memref<2x1x32xf32, #tpu.memory_space<vmem>>, vector<1x1x32xf32>,
    %c1_79 = arith.constant 1 : index
    %c0_80 = arith.constant 0 : index
    %c0_81 = arith.constant 0 : index
    %334 = vector.load %arg10[%c1_79, %c0_80, %c0_81] : memref<2x1x32xf32, #tpu.memory_space<vmem>>, vector<1x1x32xf32>
    %335 = vector.shape_cast %334 : vector<1x1x32xf32> to vector<1x32xf32>
    %336 = vector.shape_cast %319 : vector<1x32xf32> to vector<1x1x32xf32>
    tpu.vector_store %arg10[%c1_79, %c0_80, %c0_81], %336 {strides = array<i32>} : memref<2x1x32xf32, #tpu.memory_space<vmem>>, vector<1x1x32xf32>,
    return
  }
  func.func @transform_0(%arg0: i32) -> (i32, i32) {
    %c0_i32 = arith.constant 0 : i32
    %c0_i32_0 = arith.constant 0 : i32
    return %arg0, %c0_i32 : i32, i32
  }
  func.func @transform_1(%arg0: i32) -> (i32, i32) {
    %c0_i32 = arith.constant 0 : i32
    %c0_i32_0 = arith.constant 0 : i32
    %c0_i32_1 = arith.constant 0 : i32
    return %c0_i32, %c0_i32_0 : i32, i32
  }
  func.func @transform_2(%arg0: i32) -> (i32, i32) {
    %c0_i32 = arith.constant 0 : i32
    %c0_i32_0 = arith.constant 0 : i32
    %c0_i32_1 = arith.constant 0 : i32
    return %c0_i32, %c0_i32_0 : i32, i32
  }
  func.func @transform_3(%arg0: i32) -> (i32, i32) {
    %c0_i32 = arith.constant 0 : i32
    %c0_i32_0 = arith.constant 0 : i32
    %c0_i32_1 = arith.constant 0 : i32
    return %c0_i32, %c0_i32_0 : i32, i32
  }
  func.func @transform_4(%arg0: i32) -> (i32, i32) {
    %c0_i32 = arith.constant 0 : i32
    %c0_i32_0 = arith.constant 0 : i32
    %c0_i32_1 = arith.constant 0 : i32
    return %c0_i32, %c0_i32_0 : i32, i32
  }
  func.func @transform_5(%arg0: i32) -> (i32, i32) {
    %c0_i32 = arith.constant 0 : i32
    %c0_i32_0 = arith.constant 0 : i32
    %c0_i32_1 = arith.constant 0 : i32
    return %c0_i32, %c0_i32_0 : i32, i32
  }
  func.func @transform_6(%arg0: i32) -> (i32, i32) {
    %c0_i32 = arith.constant 0 : i32
    %c0_i32_0 = arith.constant 0 : i32
    %c0_i32_1 = arith.constant 0 : i32
    return %c0_i32, %c0_i32_0 : i32, i32
  }
  func.func @transform_7(%arg0: i32) -> (i32, i32) {
    %c0_i32 = arith.constant 0 : i32
    %c0_i32_0 = arith.constant 0 : i32
    return %arg0, %c0_i32 : i32, i32
  }
}

</mosaic_0001>

<bundles_post_ra>
// kernel: tpu_custom_call.1
= control target key start
LH: loop header
LB: loop body
LE: loop exit
PB: predicated region body
PF: predicated region fallthrough
CT: control target
= control target key end

     0   :  { %12 = vsyncpa [#allocation6], 0  ;;  %s3873_s0 = inlined_call_operand.hbm [shape: f32[8,16], index: 0, kind: input, shape index: {}]   ;;  %s3874_s1 = inlined_call_operand.hbm [shape: f32[16,128], index: 1, kind: input, shape index: {}]   ;;  %s3875_s2 = inlined_call_operand.hbm [shape: f32[32,128], index: 2, kind: input, shape index: {}]   ;;  %s3876_s3 = inlined_call_operand.vmem [shape: f32[1,128], index: 3, kind: input, shape index: {}]   ;;  %s3877_s4 = inlined_call_operand.hbm [shape: f32[32,128], index: 4, kind: input, shape index: {}]   ;;  %s3878_s5 = inlined_call_operand.hbm [shape: f32[32,128], index: 5, kind: input, shape index: {}]   ;;  %s3879_s6 = inlined_call_operand.vmem [shape: f32[1,128], index: 6, kind: input, shape index: {}]   ;;  %s3880_s7 = inlined_call_operand.hbm [shape: f32[8,32], index: 7, kind: output, shape index: {}]  }
   0x1   :  { %13 = vsyncpa [#allocation9], 0 }
   0x2   :  { %14 = vsyncpa [#allocation12], 0 }
   0x3   :  { %15 = vsyncpa [#allocation7], 0  ;;  %s3373_s24 = smov [#allocation8]   ;;  %s3233_s28 = scalar_lea.hbm %s3874_s1, 256 }
   0x4   :  { %s31_s25 = sshll.u32 %s3373_s24, 4  ;;  %p3234_p0 = scmp.ne.s32.totalorder %s3874_s1, %s3233_s28  ;;  %s32_s25 = int_to_ptr.vmem [resolvable:$true] %s31_s25 }
   0x5   :  { %p3237_p1 = scmp.lt.u32.totalorder %s3233_s28, %s3874_s1 }
   0x7   :  { %p3239_p2 = pnand %p3237_p1, %p3234_p0 }
   0x9   :  { %3242 = shalt.err (!%p3239_p2)
}
   0xa   :  { %s3243_s10 = scalar_lea.vmem %s32_s25, 256  ;;  %p3248_p4 = scmp.lt.s32.totalorder %s32_s25, %s32_s25 }
   0xb   :  { %p3244_p3 = scmp.ne.s32.totalorder %s32_s25, %s3243_s10  ;;  %p3249_p5 = scmp.lt.s32.totalorder %s3243_s10, %s3243_s10 }
   0xd   :  { %p3250_p6 = por %p3249_p5, %p3248_p4 }
   0xf   :  { %p3251_p7 = pnand %p3250_p6, %p3244_p3 }
  0x11   :  { %3254 = shalt.err (!%p3251_p7)
}
  0x12   :  { %s3374_s11 = smov 128   ;;  %s3375_s12 = smov 8  }
  0x13   :  { %37 = dma.hbm_to_vmem [thread:$0]  %s3874_s1, 256, %s32_s25, [#allocation9], %s3374_s11, %s3374_s11, %s3375_s12  }
  0x14   :  { %s3376_s15 = smov [#allocation11]   ;;  %s3377_s17 = smov [#allocation5]  }
  0x15   :  { %s57_s16 = sshll.u32 %s3376_s15, 4  ;;  %s22_s18 = sshll.u32 %s3377_s17, 4  ;;  %s58_s16 = int_to_ptr.vmem [resolvable:$true] %s57_s16  ;;  %s23_s18 = int_to_ptr.vmem [resolvable:$true] %s22_s18 }
  0x16   :  { %s3255_s21 = scalar_lea.hbm %s3877_s4, 512 }
  0x17   :  { %p3256_p8 = scmp.ne.s32.totalorder %s3877_s4, %s3255_s21  ;;  %p3259_p9 = scmp.lt.u32.totalorder %s3255_s21, %s3877_s4 }
  0x19   :  { %p3261_p10 = pnand %p3259_p9, %p3256_p8 }
  0x1b   :  { %3264 = shalt.err (!%p3261_p10)
}
  0x1c   :  { %s3265_s1 = scalar_lea.vmem %s58_s16, 512  ;;  %p3270_p12 = scmp.lt.s32.totalorder %s58_s16, %s58_s16 }
  0x1d   :  { %p3266_p11 = scmp.ne.s32.totalorder %s58_s16, %s3265_s1  ;;  %p3271_p13 = scmp.lt.s32.totalorder %s3265_s1, %s3265_s1 }
  0x1f   :  { %p3272_p0 = por %p3271_p13, %p3270_p12 }
  0x21   :  { %p3273_p1 = pnand %p3272_p0, %p3266_p11 }
  0x23   :  { %3276 = shalt.err (!%p3273_p1)
}
  0x24   :  { %63 = dma.hbm_to_vmem [thread:$0]  %s3877_s4, 512, %s58_s16, [#allocation12], %s3374_s11, %s3374_s11, %s3375_s12  }
  0x25   :  { %s3277_s30 = scalar_lea.hbm %s3873_s0, 128 }
  0x26   :  { %p3278_p2 = scmp.ne.s32.totalorder %s3873_s0, %s3277_s30  ;;  %p3281_p3 = scmp.lt.u32.totalorder %s3277_s30, %s3873_s0 }
  0x28   :  { %p3283_p4 = pnand %p3281_p3, %p3278_p2 }
  0x2a   :  { %3286 = shalt.err (!%p3283_p4)
}
  0x2b   :  { %s3287_s14 = scalar_lea.vmem %s23_s18, 128  ;;  %p3292_p6 = scmp.lt.s32.totalorder %s23_s18, %s23_s18 }
  0x2c   :  { %p3288_p5 = scmp.ne.s32.totalorder %s23_s18, %s3287_s14  ;;  %p3293_p7 = scmp.lt.s32.totalorder %s3287_s14, %s3287_s14 }
  0x2e   :  { %p3294_p8 = por %p3293_p7, %p3292_p6 }
  0x30   :  { %p3295_p9 = pnand %p3294_p8, %p3288_p5 }
  0x32   :  { %3298 = shalt.err (!%p3295_p9)
}
  0x33   :  { %25 = dma.hbm_to_vmem [thread:$0]  %s3873_s0, 128, %s23_s18, [#allocation6]  }
  0x34   :  { %s3378_s16 = smov [#allocation10]   ;;  %s3379_s19 = smov [#allocation13]  }
  0x35   :  { %s43_s17 = sshll.u32 %s3378_s16, 4  ;;  %s69_s20 = sshll.u32 %s3379_s19, 4  ;;  %s44_s17 = int_to_ptr.vmem [resolvable:$true] %s43_s17  ;;  %s70_s20 = int_to_ptr.vmem [resolvable:$true] %s69_s20 }
  0x36   :  { %s3299_s23 = scalar_lea.hbm %s3875_s2, 512 }
  0x37   :  { %p3300_p10 = scmp.ne.s32.totalorder %s3875_s2, %s3299_s23  ;;  %p3303_p11 = scmp.lt.u32.totalorder %s3299_s23, %s3875_s2 }
  0x39   :  { %p3305_p12 = pnand %p3303_p11, %p3300_p10 }
  0x3b   :  { %3308 = shalt.err (!%p3305_p12)
}
  0x3c   :  { %s3309_s0 = scalar_lea.vmem %s44_s17, 512  ;;  %p3314_p0 = scmp.lt.s32.totalorder %s44_s17, %s44_s17 }
  0x3d   :  { %p3310_p13 = scmp.ne.s32.totalorder %s44_s17, %s3309_s0  ;;  %p3315_p1 = scmp.lt.s32.totalorder %s3309_s0, %s3309_s0 }
  0x3f   :  { %p3316_p2 = por %p3315_p1, %p3314_p0 }
  0x41   :  { %p3317_p3 = pnand %p3316_p2, %p3310_p13 }
  0x43   :  { %3320 = shalt.err (!%p3317_p3)
}
  0x44   :  { %49 = dma.hbm_to_vmem [thread:$0]  %s3875_s2, 512, %s44_s17, [#allocation9], %s3374_s11, %s3374_s11, %s3375_s12  }
  0x45   :  { %s3321_s30 = scalar_lea.hbm %s3878_s5, 512 }
  0x46   :  { %p3322_p4 = scmp.ne.s32.totalorder %s3878_s5, %s3321_s30  ;;  %p3325_p5 = scmp.lt.u32.totalorder %s3321_s30, %s3878_s5 }
  0x48   :  { %p3327_p6 = pnand %p3325_p5, %p3322_p4 }
  0x4a   :  { %3330 = shalt.err (!%p3327_p6)
}
  0x4b   :  { %s3331_s14 = scalar_lea.vmem %s70_s20, 512  ;;  %p3336_p8 = scmp.lt.s32.totalorder %s70_s20, %s70_s20 }
  0x4c   :  { %p3332_p7 = scmp.ne.s32.totalorder %s70_s20, %s3331_s14  ;;  %p3337_p9 = scmp.lt.s32.totalorder %s3331_s14, %s3331_s14 }
  0x4e   :  { %p3338_p10 = por %p3337_p9, %p3336_p8 }
  0x50   :  { %p3339_p11 = pnand %p3338_p10, %p3332_p7 }
  0x52   :  { %3342 = shalt.err (!%p3339_p11)
}
  0x53   :  { %75 = dma.hbm_to_vmem [thread:$0]  %s3878_s5, 512, %s70_s20, [#allocation12], %s3374_s11, %s3374_s11, %s3375_s12  }
  0x54   :  { %3365 = dma.done.wait [#allocation6], 128  }
  0x55   :  { %3366 = vsyncadd [#allocation6], 4294967168 }
  0x56   :  { %3367 = dma.done.wait [#allocation9], 768  }
  0x57   :  { %3368 = vsyncadd [#allocation9], 4294966528 }
  0x58   :  { %3369 = dma.done.wait [#allocation12], 1024  }
  0x59   :  { %3370 = vsyncadd [#allocation12], 4294966272  ;;  %v3380_v0 = vmov 0.0|0.0   ;;  %vm97_vm0 = vcmask 253952   ;;  %vm3381_vm1 = vmmov 0   ;;  %v3382_v1 = vmov 0.0  }
  0x5a   :  { %2946 = vmatprep.subr.bf16.mxu1 %v3380_v0  ;;  %2943 = vmatprep.subr.bf16.mxu0 %v3380_v0  ;;  %98 = vst.msk [vmem:[#allocation2] sm:$0x1] %vm97_vm0, %v3382_v1  ;;  %99 = vst.msk [vmem:[#allocation2 + $0x1] sm:$0x1] %vm97_vm0, %v3382_v1  ;;  %v187_v2 = vld [vmem:[#allocation10] sm:$0xff]  ;;  %v188_v3 = vld [vmem:[#allocation10 + $0x8] sm:$0xff] }
  0x5b   :  { %2676 = vmatprep.mubr.msk.f32.mxu0 %vm3381_vm1, %v3382_v1  ;;  %2687 = vmatprep.mubr.msk.f32.mxu1 %vm3381_vm1, %v3382_v1  ;;  %100 = vst.msk [vmem:[#allocation3] sm:$0x1] %vm97_vm0, %v3382_v1  ;;  %101 = vst.msk [vmem:[#allocation3 + $0x1] sm:$0x1] %vm97_vm0, %v3382_v1  ;;  %v103_v4 = vld [vmem:[#allocation8] sm:$0xff]  ;;  %v3513_v5 = vpack.c.bf16 %v188_v3, %v187_v2  ;;  %v104_v6 = vld [vmem:[#allocation8 + $0x8] sm:$0xff] }
  0x5c   :  { %v189_v7 = vld [vmem:[#allocation10 + $0x10] sm:$0xff]  ;;  %v2944_v8 = vpack.c.bf16 %v104_v6, %v103_v4  ;;  %v190_v9 = vld [vmem:[#allocation10 + $0x18] sm:$0xff]  ;;  %v102_v11 = vld [vmem:[#allocation5] sm:$0xff]  ;;  %vm112_vm2 = vcmask 130048   ;;  %vm207_vm3 = vcmask 261120   ;;  %s3383_s12 = smov 64  }
  0x5d   :  { %2948 = vmatpush3.bf16.msra.mxu1 %v3513_v5  ;;  %v3516_v10 = vpack.c.bf16 %v190_v9, %v189_v7  ;;  %v2505_v13 = vld [vmem:[%s3876_s3] ss:$0 sm:$0xff]  ;;  %s3384_s15 = smov 32   ;;  %v192_v33 = vld [vmem:[#allocation13 + $0x8] sm:$0xff]  ;;  %v193_v34 = vld [vmem:[#allocation13 + $0x10] sm:$0xff]  ;;  %vm2449_vm4 = vcmask 1040384  }
  0x5e   :  { %2945 = vmatpush3.bf16.msra.mxu0 %v2944_v8  ;;  %2949 = vmatprep.subr.bf16.mxu1 %v3380_v0  ;;  %v191_v32 = vld [vmem:[#allocation13] sm:$0xff]  ;;  %v194_v36 = vld [vmem:[#allocation13 + $0x18] sm:$0xff]  ;;  %v196_v38 = vld [vmem:[#allocation11 + $0x8] sm:$0xff]  ;;  %vm2451_vm5 = vcmask 1041408   ;;  %vm2453_vm6 = vcmask 1042432   ;;  %vm2455_vm7 = vcmask 1043456  }
  0x5f   :  { %2952 = vmatprep.subr.bf16.mxu0 %v3380_v0  ;;  %v3539_v35 = vpack.c.bf16 %v192_v33, %v191_v32  ;;  %v195_v37 = vld [vmem:[#allocation11] sm:$0xff]  ;;  %v197_v39 = vld [vmem:[#allocation11 + $0x10] sm:$0xff]  ;;  %v198_v40 = vld [vmem:[#allocation11 + $0x18] sm:$0xff]  ;;  %v3542_v41 = vpack.c.bf16 %v194_v36, %v193_v34  ;;  %vm2457_vm8 = vcmask 1044480   ;;  %vm2459_vm9 = vcmask 1045504   ;;  %s3385_s20 = smov 96  }
  0x60   :  { %v3544_v42 = vpack.c.bf16 %v196_v38, %v195_v37  ;;  %v3548_v43 = vpack.c.bf16 %v198_v40, %v197_v39  ;;  %v3581_v51 = vld [vmem:[%s3879_s6] sm:$0x1]  ;;  %vm2471_vm10 = vcmask 261127   ;;  %vm2461_vm11 = vcmask 1046528  }
  0x61   :  { %2677 = vmatmul.mubr.msk.f32.vlgmr.msra.gmra.mrb[0].mxu0 %vm112_vm2, %v102_v11  ;;  %2951 = vmatpush3.bf16.msra.mxu1 %v3516_v10  ;;  %v200_v12 = vld [vmem:[#allocation2] sm:$0x1]  ;;  %v202_v44 = vld [vmem:[#allocation2 + $0x1] sm:$0x1] }
  0x62   :  { %2698 = vmatprep.mubr.msk.f32.mxu0 %vm3381_vm1, %v3382_v1  ;;  %2958 = vmatprep.subr.bf16.mxu1 %v3380_v0  ;;  %v2509_v21 = vld [vmem:[#allocation3] ss:$0 sm:$0xff]  ;;  %v2513_v62 = vld [vmem:[#allocation3 + $0x1] ss:$0 sm:$0xff] }
  0x63   :  { %2954 = vmatpush3.bf16.msra.mxu0 %v3539_v35 }
  0x64   :  { %2688 = vmatmul.mubr.msk.f32.vlgmr.msra.gmra.mrb[0].mxu1 %vm207_vm3, %v200_v12  ;;  %2955 = vmatprep.subr.bf16.mxu0 %v3380_v0 }
  0x65   :  { %2709 = vmatprep.mubr.msk.f32.mxu1 %vm3381_vm1, %v3382_v1  ;;  %2960 = vmatpush3.bf16.msra.mxu1 %v3544_v42 }
  0x66   :  { %2961 = vmatprep.subr.bf16.mxu1 %v3380_v0 }
  0x67   :  { %2957 = vmatpush3.bf16.msra.mxu0 %v3542_v41 }
  0x68   :  { %2964 = vmatprep.subr.bf16.mxu0 %v3380_v0 }
  0x69   :  { %2963 = vmatpush3.bf16.msra.mxu1 %v3548_v43 }
  0x6a   :  { %2699 = vmatmul.mubr.msk.f32.vlgmr.msra.gmra.mrb[2].mxu0 %vm207_vm3, %v202_v44  ;;  %2970 = vmatprep.subr.bf16.mxu1 %v3380_v0 }
  0x6b   :  { %2966 = vmatpush3.bf16.msra.mxu0 %v3513_v5  ;;  %2720 = vmatprep.mubr.msk.f32.mxu0 %vm3381_vm1, %v3382_v1 }
  0x6c   :  { %2967 = vmatprep.subr.bf16.mxu0 %v3380_v0 }
  0x6f   :  { %2969 = vmatpush3.bf16.msra.mxu0 %v3516_v10 }
  0x70   :  { %2976 = vmatprep.subr.bf16.mxu0 %v3380_v0 }
 0x134   :  { %v182_v14 = vpop.f32.mrb[0].mxu0 }
 0x135   :  { %v3530_v15 = vadd.f32 %v2505_v13, %v182_v14  ;;  %v2678_v16 = vpop.f32.mrb[1].mxu0 }
 0x137   :  { %v277_v17 = vpop.f32.mrb[0].mxu1 }
 0x138   :  { %v281_v18 = vadd.f32 %v277_v17, %v3530_v15  ;;  %v2689_v19 = vpop.f32.mrb[1].mxu1 }
 0x13a   :  { %3104 = vtanh.f32 %v281_v18  ;;  %v2508_v22 = vmul.f32 -1.442695, %v281_v18 }
 0x13c   :  { %3106 = vpow2.f32 %v2508_v22 }
 0x13d   :  { %v383_v48 = vpop.f32.mrb[2].mxu0 }
 0x13e   :  { %v2700_v49 = vpop.f32.mrb[3].mxu0 }
 0x144   :  { %v3105_v20 = vpop.eup %3104 }
 0x145   :  { %299 = vrot.lane.b32.xlu0 %v3105_v20, %s3383_s12 }
 0x146   :  { %v3107_v23 = vpop.eup %3106 }
 0x147   :  { %v285_v24 = vadd.f32 1.0, %v3107_v23 }
 0x149   :  { %294 = vrot.lane.b32.xlu0 %v2509_v21, %s3384_s15  ;;  %3108 = vrcp.f32 %v285_v24 }
 0x153   :  { %v3109_v25 = vpop.eup %3108 }
 0x1b7   :  { %v300_v26 = vpop.permute.xlu0 %299 }
 0x1b8   :  { %v302_v27 = vmul.f32 %v3109_v25, %v300_v26 }
 0x1ba   :  { %304 = vrot.lane.b32.xlu1 %v302_v27, %s3384_s15 }
 0x1bb   :  { %v295_v28 = vpop.permute.xlu0 %294 }
 0x1bc   :  { %v297_v29 = vmul.f32 %v3109_v25, %v295_v28 }
 0x22c   :  { %v305_v30 = vpop.permute.xlu1 %304 }
 0x22d   :  { %v3536_v31 = vadd.f32 %v305_v30, %v297_v29 }
 0x22f   :  { %3110 = vtanh.f32 %v3536_v31  ;;  %v577_v17 = vrot.slane %v3536_v31, 7 }
 0x239   :  { %v3111_v45 = vpop.eup %3110 }
 0x23a   :  { %310 = vrot.lane.b32.xlu1 %v3111_v45, %s3383_s12 }
 0x2ac   :  { %v311_v46 = vpop.permute.xlu1 %310 }
 0x2ad   :  { %v313_v47 = vmul.f32 %v3109_v25, %v311_v46 }
 0x2af   :  { %388 = vrot.lane.b32.xlu0 %v313_v47, %s3384_s15 }
 0x321   :  { %v389_v50 = vpop.permute.xlu0 %388 }
 0x322   :  { %2710 = vmatmul.mubr.msk.f32.vlgmr.msra.gmra.mrb[2].mxu1 %vm207_vm3, %v389_v50  ;;  %2721 = vmatmul.mubr.msk.f32.vlgmr.msra.gmra.mrb[4].mxu0 %vm207_vm3, %v389_v50 }
 0x323   :  { %2972 = vmatpush3.bf16.msra.mxu1 %v3539_v35  ;;  %2978 = vmatpush3.bf16.msra.mxu0 %v3544_v42 }
 0x324   :  { %2973 = vmatprep.subr.bf16.mxu1 %v3380_v0  ;;  %2979 = vmatprep.subr.bf16.mxu0 %v3380_v0 }
 0x325   :  { %2731 = vmatprep.mubr.msk.f32.mxu1 %vm3381_vm1, %v3382_v1  ;;  %2742 = vmatprep.mubr.msk.f32.mxu0 %vm3381_vm1, %v3382_v1 }
 0x327   :  { %2975 = vmatpush3.bf16.msra.mxu1 %v3542_v41  ;;  %2981 = vmatpush3.bf16.msra.mxu0 %v3548_v43 }
 0x328   :  { %2982 = vmatprep.subr.bf16.mxu1 %v3380_v0  ;;  %2988 = vmatprep.subr.bf16.mxu0 %v3380_v0 }
 0x3f5   :  { %v458_v52 = vpop.f32.mrb[2].mxu1  ;;  %v561_v53 = vpop.f32.mrb[4].mxu0 }
 0x3f6   :  { %v459_v54 = vadd.f32 %v458_v52, %v383_v48  ;;  %v566_v55 = vrot.slane %v561_v53, 7  ;;  %v2711_v56 = vpop.f32.mrb[3].mxu1  ;;  %v2722_v57 = vpop.f32.mrb[5].mxu0 }
 0x3f8   :  { %v462_v58 = vadd.f32 %v459_v54, %v3581_v51  ;;  %v568_v59 = vadd.f32 %v566_v55, %v3530_v15 }
 0x3fa   :  { %3112 = vtanh.f32 %v462_v58  ;;  %v2512_v63 = vmul.f32 -1.442695, %v462_v58  ;;  %v2515_v2 = vmul.f32 -1.442695, %v568_v59 }
 0x3fb   :  { %3114 = vtanh.f32 %v568_v59 }
 0x3fc   :  { %3116 = vpow2.f32 %v2512_v63 }
 0x3fd   :  { %3118 = vpow2.f32 %v2515_v2 }
 0x404   :  { %v3113_v60 = vpop.eup %3112 }
 0x405   :  { %v3115_v61 = vpop.eup %3114  ;;  %480 = vrot.lane.b32.xlu1 %v3113_v60, %s3383_s12 }
 0x406   :  { %581 = vrot.lane.b32.xlu0 %v3115_v61, %s3383_s12  ;;  %v3117_v3 = vpop.eup %3116 }
 0x407   :  { %v3119_v4 = vpop.eup %3118  ;;  %v466_v6 = vadd.f32 1.0, %v3117_v3 }
 0x408   :  { %v572_v7 = vadd.f32 1.0, %v3119_v4 }
 0x409   :  { %475 = vrot.lane.b32.xlu1 %v2513_v62, %s3384_s15  ;;  %3120 = vrcp.f32 %v466_v6 }
 0x40a   :  { %3122 = vrcp.f32 %v572_v7 }
 0x413   :  { %v3121_v8 = vpop.eup %3120 }
 0x414   :  { %v3123_v11 = vpop.eup %3122 }
 0x415   :  { %v579_v19 = vmul.f32 %v3123_v11, %v577_v17 }
 0x477   :  { %v481_v9 = vpop.permute.xlu1 %480 }
 0x478   :  { %v582_v12 = vpop.permute.xlu0 %581  ;;  %v483_v13 = vmul.f32 %v3121_v8, %v481_v9 }
 0x479   :  { %v584_v14 = vmul.f32 %v3123_v11, %v582_v12 }
 0x47a   :  { %485 = vrot.lane.b32.xlu0 %v483_v13, %s3384_s15 }
 0x47b   :  { %586 = vrot.lane.b32.xlu1 %v584_v14, %s3384_s15  ;;  %v476_v16 = vpop.permute.xlu1 %475 }
 0x47c   :  { %v478_v18 = vmul.f32 %v3121_v8, %v476_v16 }
 0x4ec   :  { %v486_v20 = vpop.permute.xlu0 %485 }
 0x4ed   :  { %v587_v21 = vpop.permute.xlu1 %586  ;;  %v3591_v22 = vadd.f32 %v486_v20, %v478_v18 }
 0x4ee   :  { %v3593_v23 = vadd.f32 %v587_v21, %v579_v19 }
 0x4ef   :  { %3124 = vtanh.f32 %v3591_v22 }
 0x4f0   :  { %3126 = vtanh.f32 %v3593_v23  ;;  %v854_v3 = vrot.slane %v3593_v23, 7 }
 0x4f9   :  { %v3125_v24 = vpop.eup %3124 }
 0x4fa   :  { %v3127_v25 = vpop.eup %3126  ;;  %491 = vrot.lane.b32.xlu0 %v3125_v24, %s3383_s12 }
 0x4fb   :  { %592 = vrot.lane.b32.xlu1 %v3127_v25, %s3383_s12 }
 0x56c   :  { %v492_v26 = vpop.permute.xlu0 %491 }
 0x56d   :  { %v593_v27 = vpop.permute.xlu1 %592  ;;  %v3599_v28 = vmul.f32 %v3121_v8, %v492_v26 }
 0x56e   :  { %v595_v29 = vmul.f32 %v3123_v11, %v593_v27 }
 0x56f   :  { %597 = vrot.lane.b32.xlu0 %v3599_v28, %s3384_s15 }
 0x570   :  { %v672_v30 = vrot.slane %v595_v29, 1 }
 0x572   :  { %673 = vrot.lane.b32.xlu1 %v672_v30, %s3384_s15 }
 0x5e1   :  { %v598_v31 = vpop.permute.xlu0 %597 }
 0x5e2   :  { %2732 = vmatmul.mubr.msk.f32.vlgmr.msra.gmra.mrb[4].mxu1 %vm207_vm3, %v598_v31 }
 0x5e3   :  { %2984 = vmatpush3.bf16.msra.mxu1 %v3513_v5  ;;  %2753 = vmatprep.mubr.msk.f32.mxu1 %vm3381_vm1, %v3382_v1 }
 0x5e4   :  { %v674_v32 = vpop.permute.xlu1 %673  ;;  %2985 = vmatprep.subr.bf16.mxu1 %v3380_v0 }
 0x5e5   :  { %2743 = vmatmul.mubr.msk.f32.vlgmr.msra.gmra.mrb[6].mxu0 %vm207_vm3, %v674_v32 }
 0x5e6   :  { %2990 = vmatpush3.bf16.msra.mxu0 %v3539_v35  ;;  %2764 = vmatprep.mubr.msk.f32.mxu0 %vm3381_vm1, %v3382_v1 }
 0x5e7   :  { %2987 = vmatpush3.bf16.msra.mxu1 %v3516_v10  ;;  %2991 = vmatprep.subr.bf16.mxu0 %v3380_v0 }
 0x5e8   :  { %2994 = vmatprep.subr.bf16.mxu1 %v3380_v0 }
 0x5ea   :  { %2754 = vmatmul.mubr.msk.f32.vlgmr.msra.gmra.mrb[6].mxu1 %vm207_vm3, %v674_v32  ;;  %2993 = vmatpush3.bf16.msra.mxu0 %v3542_v41 }
 0x5eb   :  { %3000 = vmatprep.subr.bf16.mxu0 %v3380_v0  ;;  %2996 = vmatpush3.bf16.msra.mxu1 %v3544_v42 }
 0x5ec   :  { %2997 = vmatprep.subr.bf16.mxu1 %v3380_v0  ;;  %2775 = vmatprep.mubr.msk.f32.mxu1 %vm3381_vm1, %v3382_v1 }
 0x5ef   :  { %2999 = vmatpush3.bf16.msra.mxu1 %v3548_v43 }
 0x5f0   :  { %3006 = vmatprep.subr.bf16.mxu1 %v3380_v0 }
 0x6b5   :  { %v667_v33 = vpop.f32.mrb[4].mxu1 }
 0x6b6   :  { %v2733_v34 = vpop.f32.mrb[5].mxu1 }
 0x6b8   :  { %v743_v36 = vpop.f32.mrb[6].mxu0 }
 0x6b9   :  { %v744_v37 = vadd.f32 %v743_v36, %v667_v33  ;;  %v2744_v38 = vpop.f32.mrb[7].mxu0 }
 0x6bb   :  { %v747_v39 = vadd.f32 %v744_v37, %v3581_v51 }
 0x6bd   :  { %3128 = vtanh.f32 %v747_v39  ;;  %v838_v40 = vpop.f32.mrb[6].mxu1  ;;  %v2518_v49 = vmul.f32 -1.442695, %v747_v39 }
 0x6be   :  { %v843_v44 = vrot.slane %v838_v40, 6  ;;  %v2755_v45 = vpop.f32.mrb[7].mxu1 }
 0x6c0   :  { %v845_v46 = vadd.f32 %v843_v44, %v3530_v15 }
 0x6c2   :  { %3130 = vtanh.f32 %v845_v46  ;;  %v2520_v50 = vmul.f32 -1.442695, %v845_v46 }
 0x6c3   :  { %3132 = vpow2.f32 %v2518_v49 }
 0x6c4   :  { %3134 = vpow2.f32 %v2520_v50 }
 0x6c7   :  { %v3129_v47 = vpop.eup %3128 }
 0x6c8   :  { %757 = vrot.lane.b32.xlu0 %v3129_v47, %s3383_s12 }
 0x6cc   :  { %v3131_v48 = vpop.eup %3130 }
 0x6cd   :  { %858 = vrot.lane.b32.xlu1 %v3131_v48, %s3383_s12  ;;  %v3133_v52 = vpop.eup %3132 }
 0x6ce   :  { %v751_v53 = vadd.f32 1.0, %v3133_v52  ;;  %v3135_v54 = vpop.eup %3134 }
 0x6cf   :  { %v849_v55 = vadd.f32 1.0, %v3135_v54 }
 0x6d0   :  { %3136 = vrcp.f32 %v751_v53 }
 0x6d1   :  { %3138 = vrcp.f32 %v849_v55 }
 0x6da   :  { %v3137_v56 = vpop.eup %3136 }
 0x6db   :  { %v3139_v59 = vpop.eup %3138  ;;  %v755_v62 = vmul.f32 %v3137_v56, %v3591_v22 }
 0x6dc   :  { %v856_v4 = vmul.f32 %v3139_v59, %v854_v3 }
 0x73a   :  { %v758_v57 = vpop.permute.xlu0 %757 }
 0x73b   :  { %v760_v58 = vmul.f32 %v3137_v56, %v758_v57 }
 0x73d   :  { %762 = vrot.lane.b32.xlu0 %v760_v58, %s3384_s15 }
 0x73f   :  { %v859_v60 = vpop.permute.xlu1 %858 }
 0x740   :  { %v861_v61 = vmul.f32 %v3139_v59, %v859_v60 }
 0x742   :  { %863 = vrot.lane.b32.xlu1 %v861_v61, %s3384_s15 }
 0x7af   :  { %v763_v63 = vpop.permute.xlu0 %762 }
 0x7b0   :  { %v3632_v2 = vadd.f32 %v763_v63, %v755_v62 }
 0x7b2   :  { %3140 = vtanh.f32 %v3632_v2 }
 0x7b4   :  { %v864_v6 = vpop.permute.xlu1 %863 }
 0x7b5   :  { %v3636_v7 = vadd.f32 %v864_v6, %v856_v4 }
 0x7b7   :  { %3142 = vtanh.f32 %v3636_v7  ;;  %v1131_v48 = vrot.slane %v3636_v7, 7 }
 0x7bc   :  { %v3141_v8 = vpop.eup %3140 }
 0x7bd   :  { %768 = vrot.lane.b32.xlu0 %v3141_v8, %s3383_s12 }
 0x7c1   :  { %v3143_v9 = vpop.eup %3142 }
 0x7c2   :  { %869 = vrot.lane.b32.xlu1 %v3143_v9, %s3383_s12 }
 0x82f   :  { %v769_v11 = vpop.permute.xlu0 %768 }
 0x830   :  { %v3641_v12 = vmul.f32 %v3137_v56, %v769_v11 }
 0x832   :  { %874 = vrot.lane.b32.xlu0 %v3641_v12, %s3384_s15  ;;  %v2434_v58 = vrot.slane %v3641_v12, 7 }
 0x834   :  { %v870_v13 = vpop.permute.xlu1 %869 }
 0x835   :  { %v872_v14 = vmul.f32 %v3139_v59, %v870_v13 }
 0x837   :  { %v949_v16 = vrot.slane %v872_v14, 2 }
 0x839   :  { %950 = vrot.lane.b32.xlu1 %v949_v16, %s3384_s15 }
 0x8a4   :  { %v875_v17 = vpop.permute.xlu0 %874 }
 0x8a5   :  { %2765 = vmatmul.mubr.msk.f32.vlgmr.msra.gmra.mrb[8].mxu0 %vm207_vm3, %v875_v17 }
 0x8a6   :  { %3002 = vmatpush3.bf16.msra.mxu0 %v3513_v5  ;;  %2786 = vmatprep.mubr.msk.f32.mxu0 %vm3381_vm1, %v3382_v1 }
 0x8a7   :  { %3003 = vmatprep.subr.bf16.mxu0 %v3380_v0 }
 0x8aa   :  { %3005 = vmatpush3.bf16.msra.mxu0 %v3516_v10 }
 0x8ab   :  { %v951_v18 = vpop.permute.xlu1 %950  ;;  %3012 = vmatprep.subr.bf16.mxu0 %v3380_v0 }
 0x8ac   :  { %2776 = vmatmul.mubr.msk.f32.vlgmr.msra.gmra.mrb[8].mxu1 %vm207_vm3, %v951_v18 }
 0x8ad   :  { %2787 = vmatmul.mubr.msk.f32.vlgmr.msra.gmra.mrb[10].mxu0 %vm207_vm3, %v951_v18  ;;  %3008 = vmatpush3.bf16.msra.mxu1 %v3539_v35 }
 0x8ae   :  { %3009 = vmatprep.subr.bf16.mxu1 %v3380_v0  ;;  %3014 = vmatpush3.bf16.msra.mxu0 %v3544_v42 }
 0x8af   :  { %3015 = vmatprep.subr.bf16.mxu0 %v3380_v0  ;;  %2797 = vmatprep.mubr.msk.f32.mxu1 %vm3381_vm1, %v3382_v1 }
 0x8b0   :  { %2808 = vmatprep.mubr.msk.f32.mxu0 %vm3381_vm1, %v3382_v1 }
 0x8b1   :  { %3011 = vmatpush3.bf16.msra.mxu1 %v3542_v41 }
 0x8b2   :  { %3017 = vmatpush3.bf16.msra.mxu0 %v3548_v43  ;;  %3018 = vmatprep.subr.bf16.mxu1 %v3380_v0 }
 0x8b3   :  { %3024 = vmatprep.subr.bf16.mxu0 %v3380_v0 }
 0x978   :  { %v944_v19 = vpop.f32.mrb[8].mxu0 }
 0x979   :  { %v2766_v20 = vpop.f32.mrb[9].mxu0 }
 0x97f   :  { %v1020_v21 = vpop.f32.mrb[8].mxu1 }
 0x980   :  { %v1021_v22 = vadd.f32 %v1020_v21, %v944_v19  ;;  %v1115_v23 = vpop.f32.mrb[10].mxu0  ;;  %v2777_v24 = vpop.f32.mrb[9].mxu1 }
 0x981   :  { %v1120_v25 = vrot.slane %v1115_v23, 5  ;;  %v2788_v26 = vpop.f32.mrb[11].mxu0 }
 0x982   :  { %v1024_v27 = vadd.f32 %v1021_v22, %v3581_v51 }
 0x983   :  { %v1122_v29 = vadd.f32 %v1120_v25, %v3530_v15 }
 0x984   :  { %3144 = vtanh.f32 %v1024_v27  ;;  %v2523_v32 = vmul.f32 -1.442695, %v1024_v27 }
 0x985   :  { %3146 = vtanh.f32 %v1122_v29  ;;  %v2525_v33 = vmul.f32 -1.442695, %v1122_v29 }
 0x986   :  { %3148 = vpow2.f32 %v2523_v32 }
 0x987   :  { %3150 = vpow2.f32 %v2525_v33 }
 0x98e   :  { %v3145_v30 = vpop.eup %3144 }
 0x98f   :  { %v3147_v31 = vpop.eup %3146  ;;  %1034 = vrot.lane.b32.xlu0 %v3145_v30, %s3383_s12 }
 0x990   :  { %1135 = vrot.lane.b32.xlu1 %v3147_v31, %s3383_s12  ;;  %v3149_v34 = vpop.eup %3148 }
 0x991   :  { %v3151_v36 = vpop.eup %3150  ;;  %v1028_v37 = vadd.f32 1.0, %v3149_v34 }
 0x992   :  { %v1126_v38 = vadd.f32 1.0, %v3151_v36 }
 0x993   :  { %3152 = vrcp.f32 %v1028_v37 }
 0x994   :  { %3154 = vrcp.f32 %v1126_v38 }
 0x99d   :  { %v3153_v39 = vpop.eup %3152 }
 0x99e   :  { %v3155_v44 = vpop.eup %3154  ;;  %v1032_v49 = vmul.f32 %v3153_v39, %v3632_v2  ;;  %v2450_v2 = vsel %vm2449_vm4, %v3599_v28, %v2434_v58 }
 0x99f   :  { %v1133_v50 = vmul.f32 %v3155_v44, %v1131_v48 }
 0xa01   :  { %v1035_v40 = vpop.permute.xlu0 %1034 }
 0xa02   :  { %v1136_v45 = vpop.permute.xlu1 %1135  ;;  %v1037_v46 = vmul.f32 %v3153_v39, %v1035_v40 }
 0xa03   :  { %v1138_v47 = vmul.f32 %v3155_v44, %v1136_v45 }
 0xa04   :  { %1039 = vrot.lane.b32.xlu0 %v1037_v46, %s3384_s15 }
 0xa05   :  { %1140 = vrot.lane.b32.xlu1 %v1138_v47, %s3384_s15 }
 0xa76   :  { %v1040_v52 = vpop.permute.xlu0 %1039 }
 0xa77   :  { %v1141_v53 = vpop.permute.xlu1 %1140  ;;  %v3675_v54 = vadd.f32 %v1040_v52, %v1032_v49 }
 0xa78   :  { %v3677_v55 = vadd.f32 %v1141_v53, %v1133_v50 }
 0xa79   :  { %3156 = vtanh.f32 %v3675_v54 }
 0xa7a   :  { %3158 = vtanh.f32 %v3677_v55  ;;  %v1408_v38 = vrot.slane %v3677_v55, 7 }
 0xa83   :  { %v3157_v56 = vpop.eup %3156 }
 0xa84   :  { %v3159_v57 = vpop.eup %3158  ;;  %1045 = vrot.lane.b32.xlu0 %v3157_v56, %s3383_s12 }
 0xa85   :  { %1146 = vrot.lane.b32.xlu1 %v3159_v57, %s3383_s12 }
 0xaf6   :  { %v1046_v59 = vpop.permute.xlu0 %1045 }
 0xaf7   :  { %v1147_v60 = vpop.permute.xlu1 %1146  ;;  %v1048_v61 = vmul.f32 %v3153_v39, %v1046_v59 }
 0xaf8   :  { %v1149_v62 = vmul.f32 %v3155_v44, %v1147_v60 }
 0xaf9   :  { %v2436_v63 = vrot.slane %v1048_v61, 6  ;;  %1151 = vrot.lane.b32.xlu0 %v1048_v61, %s3384_s15 }
 0xafa   :  { %v1226_v3 = vrot.slane %v1149_v62, 3 }
 0xafb   :  { %v3686_v4 = vsel %vm2451_vm5, %v2450_v2, %v2436_v63 }
 0xafc   :  { %1227 = vrot.lane.b32.xlu1 %v1226_v3, %s3384_s15 }
 0xb6b   :  { %v1152_v6 = vpop.permute.xlu0 %1151 }
 0xb6c   :  { %2798 = vmatmul.mubr.msk.f32.vlgmr.msra.gmra.mrb[10].mxu1 %vm207_vm3, %v1152_v6 }
 0xb6d   :  { %3020 = vmatpush3.bf16.msra.mxu1 %v3513_v5  ;;  %2819 = vmatprep.mubr.msk.f32.mxu1 %vm3381_vm1, %v3382_v1 }
 0xb6e   :  { %v1228_v7 = vpop.permute.xlu1 %1227  ;;  %3021 = vmatprep.subr.bf16.mxu1 %v3380_v0 }
 0xb6f   :  { %2809 = vmatmul.mubr.msk.f32.vlgmr.msra.gmra.mrb[12].mxu0 %vm207_vm3, %v1228_v7 }
 0xb70   :  { %3026 = vmatpush3.bf16.msra.mxu0 %v3539_v35  ;;  %2830 = vmatprep.mubr.msk.f32.mxu0 %vm3381_vm1, %v3382_v1 }
 0xb71   :  { %3023 = vmatpush3.bf16.msra.mxu1 %v3516_v10  ;;  %3027 = vmatprep.subr.bf16.mxu0 %v3380_v0 }
 0xb72   :  { %3030 = vmatprep.subr.bf16.mxu1 %v3380_v0 }
 0xb74   :  { %2820 = vmatmul.mubr.msk.f32.vlgmr.msra.gmra.mrb[12].mxu1 %vm207_vm3, %v1228_v7  ;;  %3029 = vmatpush3.bf16.msra.mxu0 %v3542_v41 }
 0xb75   :  { %3036 = vmatprep.subr.bf16.mxu0 %v3380_v0  ;;  %3032 = vmatpush3.bf16.msra.mxu1 %v3544_v42 }
 0xb76   :  { %3033 = vmatprep.subr.bf16.mxu1 %v3380_v0  ;;  %2841 = vmatprep.mubr.msk.f32.mxu1 %vm3381_vm1, %v3382_v1 }
 0xb79   :  { %3035 = vmatpush3.bf16.msra.mxu1 %v3548_v43 }
 0xb7a   :  { %3042 = vmatprep.subr.bf16.mxu1 %v3380_v0 }
 0xc3f   :  { %v1221_v28 = vpop.f32.mrb[10].mxu1 }
 0xc40   :  { %v2799_v8 = vpop.f32.mrb[11].mxu1 }
 0xc42   :  { %v1297_v9 = vpop.f32.mrb[12].mxu0 }
 0xc43   :  { %v1298_v11 = vadd.f32 %v1297_v9, %v1221_v28  ;;  %v2810_v12 = vpop.f32.mrb[13].mxu0 }
 0xc45   :  { %v1301_v13 = vadd.f32 %v1298_v11, %v3581_v51 }
 0xc47   :  { %3160 = vtanh.f32 %v1301_v13  ;;  %v1392_v14 = vpop.f32.mrb[12].mxu1  ;;  %v2528_v21 = vmul.f32 -1.442695, %v1301_v13 }
 0xc48   :  { %v1397_v16 = vrot.slane %v1392_v14, 4  ;;  %v2821_v17 = vpop.f32.mrb[13].mxu1 }
 0xc4a   :  { %v1399_v18 = vadd.f32 %v1397_v16, %v3530_v15 }
 0xc4c   :  { %3162 = vtanh.f32 %v1399_v18  ;;  %v2530_v22 = vmul.f32 -1.442695, %v1399_v18 }
 0xc4d   :  { %3164 = vpow2.f32 %v2528_v21 }
 0xc4e   :  { %3166 = vpow2.f32 %v2530_v22 }
 0xc51   :  { %v3161_v19 = vpop.eup %3160 }
 0xc52   :  { %1311 = vrot.lane.b32.xlu0 %v3161_v19, %s3383_s12 }
 0xc56   :  { %v3163_v20 = vpop.eup %3162 }
 0xc57   :  { %1412 = vrot.lane.b32.xlu1 %v3163_v20, %s3383_s12  ;;  %v3165_v23 = vpop.eup %3164 }
 0xc58   :  { %v1305_v24 = vadd.f32 1.0, %v3165_v23  ;;  %v3167_v25 = vpop.eup %3166 }
 0xc59   :  { %v1403_v26 = vadd.f32 1.0, %v3167_v25 }
 0xc5a   :  { %3168 = vrcp.f32 %v1305_v24 }
 0xc5b   :  { %3170 = vrcp.f32 %v1403_v26 }
 0xc64   :  { %v3169_v27 = vpop.eup %3168 }
 0xc65   :  { %v3171_v31 = vpop.eup %3170  ;;  %v1309_v34 = vmul.f32 %v3169_v27, %v3675_v54 }
 0xc66   :  { %v1410_v39 = vmul.f32 %v3171_v31, %v1408_v38 }
 0xcc4   :  { %v1312_v29 = vpop.permute.xlu0 %1311 }
 0xcc5   :  { %v1314_v30 = vmul.f32 %v3169_v27, %v1312_v29 }
 0xcc7   :  { %1316 = vrot.lane.b32.xlu0 %v1314_v30, %s3384_s15 }
 0xcc9   :  { %v1413_v32 = vpop.permute.xlu1 %1412 }
 0xcca   :  { %v1415_v33 = vmul.f32 %v3171_v31, %v1413_v32 }
 0xccc   :  { %1417 = vrot.lane.b32.xlu1 %v1415_v33, %s3384_s15 }
 0xd39   :  { %v1317_v36 = vpop.permute.xlu0 %1316 }
 0xd3a   :  { %v3717_v37 = vadd.f32 %v1317_v36, %v1309_v34 }
 0xd3c   :  { %3172 = vtanh.f32 %v3717_v37 }
 0xd3e   :  { %v1418_v40 = vpop.permute.xlu1 %1417 }
 0xd3f   :  { %v3721_v44 = vadd.f32 %v1418_v40, %v1410_v39 }
 0xd41   :  { %3174 = vtanh.f32 %v3721_v44  ;;  %v1685_v21 = vrot.slane %v3721_v44, 7 }
 0xd46   :  { %v3173_v45 = vpop.eup %3172 }
 0xd47   :  { %1322 = vrot.lane.b32.xlu0 %v3173_v45, %s3383_s12 }
 0xd4b   :  { %v3175_v46 = vpop.eup %3174 }
 0xd4c   :  { %1423 = vrot.lane.b32.xlu1 %v3175_v46, %s3383_s12 }
 0xdb9   :  { %v1323_v47 = vpop.permute.xlu0 %1322 }
 0xdba   :  { %v1325_v48 = vmul.f32 %v3169_v27, %v1323_v47 }
 0xdbc   :  { %v2438_v49 = vrot.slane %v1325_v48, 5  ;;  %1428 = vrot.lane.b32.xlu0 %v1325_v48, %s3384_s15 }
 0xdbe   :  { %v3728_v50 = vsel %vm2453_vm6, %v3686_v4, %v2438_v49  ;;  %v1424_v52 = vpop.permute.xlu1 %1423 }
 0xdbf   :  { %v1426_v53 = vmul.f32 %v3171_v31, %v1424_v52 }
 0xdc1   :  { %v1503_v54 = vrot.slane %v1426_v53, 4 }
 0xdc3   :  { %1504 = vrot.lane.b32.xlu1 %v1503_v54, %s3384_s15 }
 0xe2e   :  { %v1429_v55 = vpop.permute.xlu0 %1428 }
 0xe2f   :  { %2831 = vmatmul.mubr.msk.f32.vlgmr.msra.gmra.mrb[14].mxu0 %vm207_vm3, %v1429_v55 }
 0xe30   :  { %3038 = vmatpush3.bf16.msra.mxu0 %v3513_v5  ;;  %2852 = vmatprep.mubr.msk.f32.mxu0 %vm3381_vm1, %v3382_v1 }
 0xe31   :  { %3039 = vmatprep.subr.bf16.mxu0 %v3380_v0 }
 0xe34   :  { %3041 = vmatpush3.bf16.msra.mxu0 %v3516_v10 }
 0xe35   :  { %v1505_v56 = vpop.permute.xlu1 %1504  ;;  %3048 = vmatprep.subr.bf16.mxu0 %v3380_v0 }
 0xe36   :  { %2842 = vmatmul.mubr.msk.f32.vlgmr.msra.gmra.mrb[14].mxu1 %vm207_vm3, %v1505_v56 }
 0xe37   :  { %2853 = vmatmul.mubr.msk.f32.vlgmr.msra.gmra.mrb[16].mxu0 %vm207_vm3, %v1505_v56  ;;  %3044 = vmatpush3.bf16.msra.mxu1 %v3539_v35 }
 0xe38   :  { %3045 = vmatprep.subr.bf16.mxu1 %v3380_v0  ;;  %3050 = vmatpush3.bf16.msra.mxu0 %v3544_v42 }
 0xe39   :  { %3051 = vmatprep.subr.bf16.mxu0 %v3380_v0  ;;  %2863 = vmatprep.mubr.msk.f32.mxu1 %vm3381_vm1, %v3382_v1 }
 0xe3a   :  { %2874 = vmatprep.mubr.msk.f32.mxu0 %vm3381_vm1, %v3382_v1 }
 0xe3b   :  { %3047 = vmatpush3.bf16.msra.mxu1 %v3542_v41 }
 0xe3c   :  { %3053 = vmatpush3.bf16.msra.mxu0 %v3548_v43  ;;  %3054 = vmatprep.subr.bf16.mxu1 %v3380_v0 }
 0xe3d   :  { %3060 = vmatprep.subr.bf16.mxu0 %v3380_v0 }
 0xf02   :  { %v1498_v57 = vpop.f32.mrb[14].mxu0 }
 0xf03   :  { %v2832_v58 = vpop.f32.mrb[15].mxu0 }
 0xf09   :  { %v1574_v59 = vpop.f32.mrb[14].mxu1 }
 0xf0a   :  { %v1575_v60 = vadd.f32 %v1574_v59, %v1498_v57  ;;  %v1669_v61 = vpop.f32.mrb[16].mxu0  ;;  %v2843_v62 = vpop.f32.mrb[15].mxu1 }
 0xf0b   :  { %v1674_v63 = vrot.slane %v1669_v61, 3  ;;  %v2854_v2 = vpop.f32.mrb[17].mxu0 }
 0xf0c   :  { %v1578_v3 = vadd.f32 %v1575_v60, %v3581_v51 }
 0xf0d   :  { %v1676_v4 = vadd.f32 %v1674_v63, %v3530_v15 }
 0xf0e   :  { %3176 = vtanh.f32 %v1578_v3  ;;  %v2533_v28 = vmul.f32 -1.442695, %v1578_v3 }
 0xf0f   :  { %3178 = vtanh.f32 %v1676_v4  ;;  %v2535_v8 = vmul.f32 -1.442695, %v1676_v4 }
 0xf10   :  { %3180 = vpow2.f32 %v2533_v28 }
 0xf11   :  { %3182 = vpow2.f32 %v2535_v8 }
 0xf18   :  { %v3177_v6 = vpop.eup %3176 }
 0xf19   :  { %v3179_v7 = vpop.eup %3178  ;;  %1588 = vrot.lane.b32.xlu0 %v3177_v6, %s3383_s12 }
 0xf1a   :  { %1689 = vrot.lane.b32.xlu1 %v3179_v7, %s3383_s12  ;;  %v3181_v9 = vpop.eup %3180 }
 0xf1b   :  { %v3183_v11 = vpop.eup %3182  ;;  %v1582_v12 = vadd.f32 1.0, %v3181_v9 }
 0xf1c   :  { %v1680_v13 = vadd.f32 1.0, %v3183_v11 }
 0xf1d   :  { %3184 = vrcp.f32 %v1582_v12 }
 0xf1e   :  { %3186 = vrcp.f32 %v1680_v13 }
 0xf27   :  { %v3185_v14 = vpop.eup %3184 }
 0xf28   :  { %v3187_v17 = vpop.eup %3186  ;;  %v1586_v22 = vmul.f32 %v3185_v14, %v3717_v37 }
 0xf29   :  { %v1687_v23 = vmul.f32 %v3187_v17, %v1685_v21 }
 0xf8b   :  { %v1589_v16 = vpop.permute.xlu0 %1588 }
 0xf8c   :  { %v1690_v18 = vpop.permute.xlu1 %1689  ;;  %v1591_v19 = vmul.f32 %v3185_v14, %v1589_v16 }
 0xf8d   :  { %v1692_v20 = vmul.f32 %v3187_v17, %v1690_v18 }
 0xf8e   :  { %1593 = vrot.lane.b32.xlu0 %v1591_v19, %s3384_s15 }
 0xf8f   :  { %1694 = vrot.lane.b32.xlu1 %v1692_v20, %s3384_s15 }
0x1000   :  { %v1594_v24 = vpop.permute.xlu0 %1593 }
0x1001   :  { %v1695_v25 = vpop.permute.xlu1 %1694  ;;  %v3760_v26 = vadd.f32 %v1594_v24, %v1586_v22 }
0x1002   :  { %v3762_v27 = vadd.f32 %v1695_v25, %v1687_v23 }
0x1003   :  { %3188 = vtanh.f32 %v3760_v26 }
0x1004   :  { %3190 = vtanh.f32 %v3762_v27  ;;  %v1962_v11 = vrot.slane %v3762_v27, 7 }
0x100d   :  { %v3189_v29 = vpop.eup %3188 }
0x100e   :  { %v3191_v30 = vpop.eup %3190  ;;  %1599 = vrot.lane.b32.xlu0 %v3189_v29, %s3383_s12 }
0x100f   :  { %1700 = vrot.lane.b32.xlu1 %v3191_v30, %s3383_s12 }
0x1080   :  { %v1600_v31 = vpop.permute.xlu0 %1599 }
0x1081   :  { %v1701_v32 = vpop.permute.xlu1 %1700  ;;  %v1602_v33 = vmul.f32 %v3185_v14, %v1600_v31 }
0x1082   :  { %v1703_v34 = vmul.f32 %v3187_v17, %v1701_v32 }
0x1083   :  { %v2440_v36 = vrot.slane %v1602_v33, 4  ;;  %1705 = vrot.lane.b32.xlu0 %v1602_v33, %s3384_s15 }
0x1084   :  { %v1780_v37 = vrot.slane %v1703_v34, 5 }
0x1085   :  { %v3770_v38 = vsel %vm2455_vm7, %v3728_v50, %v2440_v36 }
0x1086   :  { %1781 = vrot.lane.b32.xlu1 %v1780_v37, %s3384_s15 }
0x10f5   :  { %v1706_v39 = vpop.permute.xlu0 %1705 }
0x10f6   :  { %2864 = vmatmul.mubr.msk.f32.vlgmr.msra.gmra.mrb[16].mxu1 %vm207_vm3, %v1706_v39 }
0x10f7   :  { %3056 = vmatpush3.bf16.msra.mxu1 %v3513_v5  ;;  %2885 = vmatprep.mubr.msk.f32.mxu1 %vm3381_vm1, %v3382_v1 }
0x10f8   :  { %v1782_v40 = vpop.permute.xlu1 %1781  ;;  %3057 = vmatprep.subr.bf16.mxu1 %v3380_v0 }
0x10f9   :  { %2875 = vmatmul.mubr.msk.f32.vlgmr.msra.gmra.mrb[18].mxu0 %vm207_vm3, %v1782_v40 }
0x10fa   :  { %3062 = vmatpush3.bf16.msra.mxu0 %v3539_v35  ;;  %2896 = vmatprep.mubr.msk.f32.mxu0 %vm3381_vm1, %v3382_v1 }
0x10fb   :  { %3059 = vmatpush3.bf16.msra.mxu1 %v3516_v10  ;;  %3063 = vmatprep.subr.bf16.mxu0 %v3380_v0 }
0x10fc   :  { %3066 = vmatprep.subr.bf16.mxu1 %v3380_v0 }
0x10fe   :  { %2886 = vmatmul.mubr.msk.f32.vlgmr.msra.gmra.mrb[18].mxu1 %vm207_vm3, %v1782_v40  ;;  %3065 = vmatpush3.bf16.msra.mxu0 %v3542_v41 }
0x10ff   :  { %3072 = vmatprep.subr.bf16.mxu0 %v3380_v0  ;;  %3068 = vmatpush3.bf16.msra.mxu1 %v3544_v42 }
0x1100   :  { %3069 = vmatprep.subr.bf16.mxu1 %v3380_v0  ;;  %2907 = vmatprep.mubr.msk.f32.mxu1 %vm3381_vm1, %v3382_v1 }
0x1103   :  { %3071 = vmatpush3.bf16.msra.mxu1 %v3548_v43 }
0x1104   :  { %3078 = vmatprep.subr.bf16.mxu1 %v3380_v0 }
0x11c9   :  { %v1775_v44 = vpop.f32.mrb[16].mxu1 }
0x11ca   :  { %v2865_v45 = vpop.f32.mrb[17].mxu1 }
0x11cc   :  { %v1851_v46 = vpop.f32.mrb[18].mxu0 }
0x11cd   :  { %v1852_v47 = vadd.f32 %v1851_v46, %v1775_v44  ;;  %v2876_v48 = vpop.f32.mrb[19].mxu0 }
0x11cf   :  { %v1855_v49 = vadd.f32 %v1852_v47, %v3581_v51 }
0x11d1   :  { %3192 = vtanh.f32 %v1855_v49  ;;  %v1946_v50 = vpop.f32.mrb[18].mxu1  ;;  %v2538_v57 = vmul.f32 -1.442695, %v1855_v49 }
0x11d2   :  { %v1951_v52 = vrot.slane %v1946_v50, 2  ;;  %v2887_v53 = vpop.f32.mrb[19].mxu1 }
0x11d4   :  { %v1953_v54 = vadd.f32 %v1951_v52, %v3530_v15 }
0x11d6   :  { %3194 = vtanh.f32 %v1953_v54  ;;  %v2540_v58 = vmul.f32 -1.442695, %v1953_v54 }
0x11d7   :  { %3196 = vpow2.f32 %v2538_v57 }
0x11d8   :  { %3198 = vpow2.f32 %v2540_v58 }
0x11db   :  { %v3193_v55 = vpop.eup %3192 }
0x11dc   :  { %1865 = vrot.lane.b32.xlu0 %v3193_v55, %s3383_s12 }
0x11e0   :  { %v3195_v56 = vpop.eup %3194 }
0x11e1   :  { %1966 = vrot.lane.b32.xlu1 %v3195_v56, %s3383_s12  ;;  %v3197_v59 = vpop.eup %3196 }
0x11e2   :  { %v1859_v60 = vadd.f32 1.0, %v3197_v59  ;;  %v3199_v61 = vpop.eup %3198 }
0x11e3   :  { %v1957_v62 = vadd.f32 1.0, %v3199_v61 }
0x11e4   :  { %3200 = vrcp.f32 %v1859_v60 }
0x11e5   :  { %3202 = vrcp.f32 %v1957_v62 }
0x11ee   :  { %v3201_v63 = vpop.eup %3200 }
0x11ef   :  { %v3203_v4 = vpop.eup %3202  ;;  %v1863_v28 = vmul.f32 %v3201_v63, %v3760_v26 }
0x11f0   :  { %v1964_v12 = vmul.f32 %v3203_v4, %v1962_v11 }
0x124e   :  { %v1866_v2 = vpop.permute.xlu0 %1865 }
0x124f   :  { %v1868_v3 = vmul.f32 %v3201_v63, %v1866_v2 }
0x1251   :  { %1870 = vrot.lane.b32.xlu0 %v1868_v3, %s3384_s15 }
0x1253   :  { %v1967_v6 = vpop.permute.xlu1 %1966 }
0x1254   :  { %v1969_v7 = vmul.f32 %v3203_v4, %v1967_v6 }
0x1256   :  { %1971 = vrot.lane.b32.xlu1 %v1969_v7, %s3384_s15 }
0x12c3   :  { %v1871_v8 = vpop.permute.xlu0 %1870 }
0x12c4   :  { %v3801_v9 = vadd.f32 %v1871_v8, %v1863_v28  ;;  %v3232_v8 = vld [vmem:[%s3879_s6] sm:$0x1]  ;;  %s3386_s6 = smov [#allocation14]  }
0x12c5   :  { %s2494_s21 = sshll.u32 %s3386_s6, 4  ;;  %s2495_s21 = int_to_ptr.vmem [resolvable:$true] %s2494_s21 }
0x12c6   :  { %3204 = vtanh.f32 %v3801_v9  ;;  %s3343_s22 = scalar_lea.vmem %s2495_s21, 128  ;;  %p3348_p13 = scmp.lt.s32.totalorder %s2495_s21, %s2495_s21 }
0x12c7   :  { %p3344_p12 = scmp.ne.s32.totalorder %s2495_s21, %s3343_s22  ;;  %p3349_p0 = scmp.lt.s32.totalorder %s3343_s22, %s3343_s22 }
0x12c8   :  { %v1972_v13 = vpop.permute.xlu1 %1971 }
0x12c9   :  { %v3805_v14 = vadd.f32 %v1972_v13, %v1964_v12  ;;  %p3350_p1 = por %p3349_p0, %p3348_p13 }
0x12cb   :  { %3206 = vtanh.f32 %v3805_v14  ;;  %v2239_v46 = vrot.slane %v3805_v14, 7  ;;  %p3351_p2 = pnand %p3350_p1, %p3344_p12 }
0x12d0   :  { %v3205_v16 = vpop.eup %3204 }
0x12d1   :  { %1876 = vrot.lane.b32.xlu0 %v3205_v16, %s3383_s12 }
0x12d5   :  { %v3207_v17 = vpop.eup %3206 }
0x12d6   :  { %1977 = vrot.lane.b32.xlu1 %v3207_v17, %s3383_s12 }
0x1343   :  { %v1877_v18 = vpop.permute.xlu0 %1876 }
0x1344   :  { %v1879_v19 = vmul.f32 %v3201_v63, %v1877_v18 }
0x1346   :  { %v2442_v20 = vrot.slane %v1879_v19, 3  ;;  %1982 = vrot.lane.b32.xlu0 %v1879_v19, %s3384_s15 }
0x1348   :  { %v1978_v21 = vpop.permute.xlu1 %1977  ;;  %v3812_v22 = vsel %vm2457_vm8, %v3770_v38, %v2442_v20 }
0x1349   :  { %v1980_v23 = vmul.f32 %v3203_v4, %v1978_v21 }
0x134b   :  { %v2057_v24 = vrot.slane %v1980_v23, 6 }
0x134d   :  { %2058 = vrot.lane.b32.xlu1 %v2057_v24, %s3384_s15 }
0x13b8   :  { %v1983_v25 = vpop.permute.xlu0 %1982 }
0x13b9   :  { %2897 = vmatmul.mubr.msk.f32.vlgmr.msra.gmra.mrb[20].mxu0 %vm207_vm3, %v1983_v25 }
0x13ba   :  { %3074 = vmatpush3.bf16.msra.mxu0 %v3513_v5  ;;  %2918 = vmatprep.mubr.msk.f32.mxu0 %vm3381_vm1, %v3382_v1 }
0x13bb   :  { %3075 = vmatprep.subr.bf16.mxu0 %v3380_v0 }
0x13be   :  { %3077 = vmatpush3.bf16.msra.mxu0 %v3516_v10 }
0x13bf   :  { %v2059_v26 = vpop.permute.xlu1 %2058  ;;  %3084 = vmatprep.subr.bf16.mxu0 %v3380_v0 }
0x13c0   :  { %2908 = vmatmul.mubr.msk.f32.vlgmr.msra.gmra.mrb[20].mxu1 %vm207_vm3, %v2059_v26 }
0x13c1   :  { %2919 = vmatmul.mubr.msk.f32.vlgmr.msra.gmra.mrb[22].mxu0 %vm207_vm3, %v2059_v26  ;;  %3080 = vmatpush3.bf16.msra.mxu1 %v3539_v35 }
0x13c2   :  { %3086 = vmatpush3.bf16.msra.mxu0 %v3544_v42  ;;  %3081 = vmatprep.subr.bf16.mxu1 %v3380_v0 }
0x13c3   :  { %3087 = vmatprep.subr.bf16.mxu0 %v3380_v0  ;;  %2929 = vmatprep.mubr.msk.f32.mxu1 %vm3381_vm1, %v3382_v1 }
0x13c4   :  { %2940 = vmatprep.mubr.msk.f32.mxu0 %vm3381_vm1, %v3382_v1 }
0x13c5   :  { %3083 = vmatpush3.bf16.msra.mxu1 %v3542_v41 }
0x13c6   :  { %3089 = vmatpush3.bf16.msra.mxu0 %v3548_v43 }
0x148c   :  { %v2052_v5 = vpop.f32.mrb[20].mxu0 }
0x148d   :  { %v2898_v10 = vpop.f32.mrb[21].mxu0 }
0x1493   :  { %v2128_v27 = vpop.f32.mrb[20].mxu1 }
0x1494   :  { %v2129_v35 = vadd.f32 %v2128_v27, %v2052_v5  ;;  %v2223_v29 = vpop.f32.mrb[22].mxu0  ;;  %v2909_v42 = vpop.f32.mrb[21].mxu1 }
0x1495   :  { %v2228_v30 = vrot.slane %v2223_v29, 1  ;;  %v2920_v31 = vpop.f32.mrb[23].mxu0 }
0x1496   :  { %v2132_v0 = vadd.f32 %v2129_v35, %v3581_v51 }
0x1497   :  { %v2230_v32 = vadd.f32 %v2228_v30, %v3530_v15 }
0x1498   :  { %3208 = vtanh.f32 %v2132_v0  ;;  %v2543_v41 = vmul.f32 -1.442695, %v2132_v0 }
0x1499   :  { %3210 = vtanh.f32 %v2230_v32  ;;  %v2545_v43 = vmul.f32 -1.442695, %v2230_v32 }
0x149a   :  { %3212 = vpow2.f32 %v2543_v41 }
0x149b   :  { %3214 = vpow2.f32 %v2545_v43 }
0x14a2   :  { %v3209_v33 = vpop.eup %3208 }
0x14a3   :  { %v3211_v1 = vpop.eup %3210  ;;  %2142 = vrot.lane.b32.xlu1 %v3209_v33, %s3383_s12 }
0x14a4   :  { %2243 = vrot.lane.b32.xlu0 %v3211_v1, %s3383_s12  ;;  %v3213_v34 = vpop.eup %3212 }
0x14a5   :  { %v3215_v36 = vpop.eup %3214  ;;  %v2136_v37 = vadd.f32 1.0, %v3213_v34 }
0x14a6   :  { %v2234_v38 = vadd.f32 1.0, %v3215_v36 }
0x14a7   :  { %3216 = vrcp.f32 %v2136_v37 }
0x14a8   :  { %3218 = vrcp.f32 %v2234_v38 }
0x14b1   :  { %v3217_v51 = vpop.eup %3216 }
0x14b2   :  { %v3219_v39 = vpop.eup %3218  ;;  %v2140_v47 = vmul.f32 %v3217_v51, %v3801_v9 }
0x14b3   :  { %v2241_v48 = vmul.f32 %v3219_v39, %v2239_v46 }
0x1515   :  { %v2143_v15 = vpop.permute.xlu1 %2142 }
0x1516   :  { %v2244_v40 = vpop.permute.xlu0 %2243  ;;  %v2145_v44 = vmul.f32 %v3217_v51, %v2143_v15 }
0x1517   :  { %v2246_v45 = vmul.f32 %v3219_v39, %v2244_v40 }
0x1518   :  { %2147 = vrot.lane.b32.xlu1 %v2145_v44, %s3384_s15 }
0x1519   :  { %2248 = vrot.lane.b32.xlu0 %v2246_v45, %s3384_s15 }
0x158a   :  { %v2148_v49 = vpop.permute.xlu1 %2147 }
0x158b   :  { %v2249_v50 = vpop.permute.xlu0 %2248  ;;  %v2150_v52 = vadd.f32 %v2148_v49, %v2140_v47 }
0x158c   :  { %v2251_v53 = vadd.f32 %v2249_v50, %v2241_v48 }
0x158d   :  { %3220 = vtanh.f32 %v2150_v52 }
0x158e   :  { %3222 = vtanh.f32 %v2251_v53 }
0x1597   :  { %v3221_v54 = vpop.eup %3220 }
0x1598   :  { %v3223_v55 = vpop.eup %3222  ;;  %2153 = vrot.lane.b32.xlu1 %v3221_v54, %s3383_s12 }
0x1599   :  { %2254 = vrot.lane.b32.xlu0 %v3223_v55, %s3383_s12 }
0x160a   :  { %v2154_v56 = vpop.permute.xlu1 %2153 }
0x160b   :  { %v2255_v57 = vpop.permute.xlu0 %2254  ;;  %v2156_v58 = vmul.f32 %v3217_v51, %v2154_v56 }
0x160c   :  { %v2257_v59 = vmul.f32 %v3219_v39, %v2255_v57 }
0x160d   :  { %v2444_v60 = vrot.slane %v2156_v58, 2  ;;  %2259 = vrot.lane.b32.xlu0 %v2156_v58, %s3384_s15 }
0x160e   :  { %v2334_v61 = vrot.slane %v2257_v59, 7 }
0x160f   :  { %v2460_v62 = vsel %vm2459_vm9, %v3812_v22, %v2444_v60 }
0x1610   :  { %2335 = vrot.lane.b32.xlu1 %v2334_v61, %s3384_s15 }
0x167f   :  { %v2260_v63 = vpop.permute.xlu0 %2259 }
0x1680   :  { %2930 = vmatmul.mubr.msk.f32.vlgmr.msra.gmra.mrb[22].mxu1 %vm207_vm3, %v2260_v63 }
0x1682   :  { %v2336_v2 = vpop.permute.xlu1 %2335 }
0x1683   :  { %2941 = vmatmul.mubr.msk.f32.vlgmr.msra.gmra.mrb[24].mxu0 %vm207_vm3, %v2336_v2 }
0x1753   :  { %v2329_v3 = vpop.f32.mrb[22].mxu1 }
0x1754   :  { %v2931_v4 = vpop.f32.mrb[23].mxu1 }
0x1756   :  { %v2405_v6 = vpop.f32.mrb[24].mxu0 }
0x1757   :  { %v2406_v7 = vadd.f32 %v2405_v6, %v2329_v3  ;;  %v2942_v28 = vpop.f32.mrb[25].mxu0 }
0x1759   :  { %v2409_v9 = vadd.f32 %v3232_v8, %v2406_v7 }
0x175b   :  { %3224 = vtanh.f32 %v2409_v9  ;;  %v2548_v12 = vmul.f32 -1.442695, %v2409_v9 }
0x175d   :  { %3226 = vpow2.f32 %v2548_v12 }
0x1765   :  { %v3225_v11 = vpop.eup %3224 }
0x1766   :  { %2419 = vrot.lane.b32.xlu0 %v3225_v11, %s3383_s12 }
0x1767   :  { %v3227_v13 = vpop.eup %3226 }
0x1768   :  { %v2413_v14 = vadd.f32 1.0, %v3227_v13 }
0x176a   :  { %3228 = vrcp.f32 %v2413_v14 }
0x1774   :  { %v3229_v16 = vpop.eup %3228 }
0x1775   :  { %v2417_v19 = vmul.f32 %v3229_v16, %v2150_v52 }
0x17d8   :  { %v2420_v17 = vpop.permute.xlu0 %2419 }
0x17d9   :  { %v2422_v18 = vmul.f32 %v3229_v16, %v2420_v17 }
0x17db   :  { %2424 = vrot.lane.b32.xlu1 %v2422_v18, %s3384_s15 }
0x17df   :  { %2474 = vrot.lane.b32.xlu1 %v2251_v53, %s3385_s20 }
0x184d   :  { %v2425_v20 = vpop.permute.xlu1 %2424 }
0x184e   :  { %v2427_v21 = vadd.f32 %v2425_v20, %v2417_v19 }
0x1850   :  { %3230 = vtanh.f32 %v2427_v21 }
0x1851   :  { %v2475_v22 = vpop.permute.xlu1 %2474 }
0x1852   :  { %2477 = vst.msk [vmem:[#allocation3 - $0x7] sm:$0x80] %vm2471_vm10, %v2475_v22 }
0x185a   :  { %v3231_v23 = vpop.eup %3230 }
0x185b   :  { %2430 = vrot.lane.b32.xlu0 %v3231_v23, %s3383_s12 }
0x185f   :  { %2468 = vrot.lane.b32.xlu0 %v2257_v59, %s3384_s15 }
0x18cd   :  { %v2431_v24 = vpop.permute.xlu0 %2430 }
0x18ce   :  { %v2433_v25 = vmul.f32 %v3229_v16, %v2431_v24 }
0x18d0   :  { %v2447_v26 = vrot.slane %v2433_v25, 1  ;;  %2478 = vrot.lane.b32.xlu0 %v2433_v25, %s3384_s15 }
0x18d1   :  { %v2469_v5 = vpop.permute.xlu0 %2468 }
0x18d2   :  { %2472 = vst.msk [vmem:[#allocation2 - $0x7] sm:$0x80] %vm2471_vm10, %v2469_v5  ;;  %v2462_v10 = vsel %vm2461_vm11, %v2460_v62, %v2447_v26 }
0x18d3   :  { %2464 = vrot.lane.b32.xlu1 %v2462_v10, %s3384_s15 }
0x18d7   :  { %2484 = vrot.lane.b32.xlu1 %v2427_v21, %s3385_s20 }
0x1942   :  { %v2479_v27 = vpop.permute.xlu0 %2478 }
0x1943   :  { %2482 = vst.msk [vmem:[#allocation2 + $0x1] sm:$0x1] %vm97_vm0, %v2479_v27 }
0x1945   :  { %v2465_v35 = vpop.permute.xlu1 %2464 }
0x1946   :  { %2467 = vst.msk [vmem:[#allocation14] sm:$0xff] %vm207_vm3, %v2465_v35 }
0x1947   :  { %3354 = shalt.err (!%p3351_p2)
}
0x1948   :  { %s3355_s26 = scalar_lea.hbm %s3880_s7, 128 }
0x1949   :  { %p3356_p3 = scmp.ne.s32.totalorder %s3880_s7, %s3355_s26  ;;  %p3359_p4 = scmp.lt.u32.totalorder %s3355_s26, %s3880_s7 }
0x194b   :  { %p3361_p5 = pnand %p3359_p4, %p3356_p3 }
0x194d   :  { %3364 = shalt.err (!%p3361_p5)
}
0x194e   :  { %2497 = dma.vmem_to_hbm [thread:$0]  %s2495_s21, 128, %s3880_s7, [#allocation7]   ;;  %v2485_v29 = vpop.permute.xlu1 %2484 }
0x194f   :  { %2487 = vst.msk [vmem:[#allocation3 + $0x1] sm:$0x1] %vm97_vm0, %v2485_v29 }
0x1950   :  { %3371 = dma.done.wait [#allocation7], 128  }
0x1951   :  { %3372 = vsyncadd [#allocation7], 4294967168 }
0x1952   :  { %2501 = vsyncpa [#allocation6], 1 }
0x1953   :  { %2502 = vsyncpa [#allocation9], 1 }
0x1954   :  { %2503 = vsyncpa [#allocation12], 1 }
0x1955   :  { %2504 = vsyncpa [#allocation7], 1 }

</bundles_post_ra>
